<compile_context>
chip_gen: v7x
topology: tpu7x:2x2x1
jax: 0.10.0
libtpu: 0.0.40
codegen_flags: <defaults>
</compile_context>

<pallas_src>
import functools
import math

import jax
import jax.numpy as jnp
from jax import lax
from jax.experimental import pallas as pl
from jax.experimental.pallas import tpu as pltpu


# ------------------------------ kernel helpers ------------------------------

def _mm(a, b):
    return jnp.dot(a, b, preferred_element_type=jnp.float32)


def _layer_norm(z, gamma, beta):
    mu = jnp.mean(z, axis=-1, keepdims=True)
    zc = z - mu
    var = jnp.mean(zc * zc, axis=-1, keepdims=True)
    return zc * lax.rsqrt(var + 1e-5) * gamma + beta


# ------------------------------ fused kernel --------------------------------

def _fused_forward_kernel(x_ref,
                          w_emb_ref, pos_ref,
                          b_qkv_ref, a_qkv_ref, c_kv_ref, d_kv_ref,
                          b_o_ref, a_o_ref, b_f1_ref, a_f1_ref,
                          b_f2_ref, a_f2_ref, ln_ref, ln_fin_ref,
                          w_proj_ref, b_proj_ref, out_ref,
                          *, n_layers, rank, n_heads, d_head, seq_len,
                          d_model, d_ff):
    H, E, R, L = n_heads, d_head, rank, seq_len
    D, F = d_model, d_ff
    HE = H * E

    # ---- DataEmbedding: circular Conv1d(k=3) via XLU sublane rolls + one
    #      fused tap matmul (time-feature Linear folded into the centre tap),
    #      plus the sinusoidal positional table (passed once, not per batch).
    xp = x_ref[...]                                     # (L, C+TF)
    xm1 = pltpu.roll(xp, shift=1, axis=0)               # row l -> x[l-1] (circular)
    xp1 = pltpu.roll(xp, shift=L - 1, axis=0)           # row l -> x[l+1] (circular)
    taps = jnp.concatenate([xm1, xp, xp1], axis=-1)     # (L, 3*(C+TF))
    x = _mm(taps, w_emb_ref[...]) + pos_ref[...]        # (L, D)

    def tr_apply(a_cat, t_wide, off, width):
        # y = sum_r A_r @ T_r  with  A_cat = [A_0 | ... | A_{R-1}]  and the
        # T_r taken as lane slices of the wide feature-matmul result, stacked
        # along sublanes -> one (·, R*L) @ (R*L, width) matmul.
        stacked = jnp.concatenate(
            [t_wide[:, off + r * width: off + (r + 1) * width] for r in range(R)],
            axis=0)
        return _mm(a_cat, stacked)

    for li in range(n_layers):
        # --- TRLinear q/k/v: one lane-dense feature matmul + 3 seq-mix matmuls
        t_qkv = _mm(x, b_qkv_ref[li])                   # (L, 3*R*HE)
        q2d = tr_apply(a_qkv_ref[li * 3 + 0], t_qkv, 0 * R * HE, HE)   # (L, HE)
        k2d = tr_apply(a_qkv_ref[li * 3 + 1], t_qkv, 1 * R * HE, HE)
        v2d = tr_apply(a_qkv_ref[li * 3 + 2], t_qkv, 2 * R * HE, HE)

        # --- LinearAttention proj_k / proj_v: head-mix feature factor + L->K
        tk = _mm(k2d, c_kv_ref[li * 2 + 0])             # (L, R*HE)
        k_red = tr_apply(d_kv_ref[li * 2 + 0], tk, 0, HE)               # (K, HE)
        tv = _mm(v2d, c_kv_ref[li * 2 + 1])
        v_red = tr_apply(d_kv_ref[li * 2 + 1], tv, 0, HE)               # (K, HE)

        # --- attention, heads batched: stack head lane-slices once, then two
        #     batched dot_generals and a single softmax.  1/sqrt(E) was folded
        #     into the q feature factors host-side; no max-subtraction needed
        #     (f32 scores over K=4 keys, bounded magnitude).
        q3 = jnp.stack([q2d[:, h * E:(h + 1) * E] for h in range(H)], axis=0)  # (H,L,E)
        k3 = jnp.stack([k_red[:, h * E:(h + 1) * E] for h in range(H)], axis=0)  # (H,K,E)
        v3 = jnp.stack([v_red[:, h * E:(h + 1) * E] for h in range(H)], axis=0)  # (H,K,E)
        s = lax.dot_general(q3, k3, (((2,), (2,)), ((0,), (0,))),
                            preferred_element_type=jnp.float32)          # (H,L,K)
        p = jnp.exp(s)
        a = p * pl.reciprocal(jnp.sum(p, axis=-1, keepdims=True), approx=True)
        o3 = lax.dot_general(a, v3, (((2,), (1,)), ((0,), (0,))),
                             preferred_element_type=jnp.float32)          # (H,L,E)
        attn_out = jnp.concatenate([o3[h] for h in range(H)], axis=-1)    # (L, HE)

        # --- TRLinear out-projection + residual + norm1
        t_o = _mm(attn_out, b_o_ref[li])                # (L, R*D)
        new_x = tr_apply(a_o_ref[li], t_o, 0, D)        # (L, D)
        x1 = _layer_norm(x + new_x, ln_ref[li * 4 + 0], ln_ref[li * 4 + 1])

        # --- FFN: TRLinear conv1 -> ReLU -> TRLinear conv2, residual + norm2
        t1 = _mm(x1, b_f1_ref[li])                      # (L, R*F)
        hmid = jnp.maximum(tr_apply(a_f1_ref[li], t1, 0, F), 0.0)        # (L, F)
        t2 = _mm(hmid, b_f2_ref[li])                    # (L, R*D)
        y = tr_apply(a_f2_ref[li], t2, 0, D)            # (L, D)
        x = _layer_norm(x1 + y, ln_ref[li * 4 + 2], ln_ref[li * 4 + 3])

    # --- final encoder LayerNorm
    x = _layer_norm(x, ln_fin_ref[0], ln_fin_ref[1])

    # --- OutputBlock (rul_estimation): pointwise Linear(d_model -> c_out)
    out_ref[...] = (_mm(x, w_proj_ref[...]) + b_proj_ref[...]).astype(out_ref.dtype)


# --------------------------- parameters (synthetic) --------------------------

def init_params(key, cfg):
    L = cfg['seq_len']; D = cfg['d_model']; H = cfg['n_heads']; E = D // H
    K = cfg['d_lower']; F = cfg['d_ff']; C = cfg['enc_in']; TF = cfg['time_feats']
    CO = cfg['c_out']; NL = cfg['e_layers']; R = cfg['rank']
    HE = H * E
    keys = iter(jax.random.split(key, 64))

    def nrm(shape, fan):
        return jax.random.normal(next(keys), shape, jnp.float32) / math.sqrt(float(fan))

    p = {}
    # TokenEmbedding (circular conv1d k=3, no bias) taps + TimeFeatureEmbedding
    # (Linear TF->D, no bias) fused into a single (3*(C+TF), D) matrix; the
    # time-mark features only contribute through the centre tap rows.
    w_tap = nrm((3, C, D), 3 * C)
    w_time = nrm((TF, D), TF)
    zeros_tf = jnp.zeros((TF, D), jnp.float32)
    p['w_emb'] = jnp.concatenate(
        [w_tap[0], zeros_tf,      # tap on x_{l-1}
         w_tap[1], w_time,        # centre tap + time features
         w_tap[2], zeros_tf],     # tap on x_{l+1}
        axis=0)                                                     # (3*(C+TF), D)

    # sinusoidal positional table (L, D) -- passed once, not tiled over batch
    pos = jnp.arange(L, dtype=jnp.float32)[:, None]
    div = jnp.exp(jnp.arange(0, D, 2, dtype=jnp.float32) * (-math.log(10000.0) / D))
    pe = jnp.zeros((L, D), jnp.float32)
    pe = pe.at[:, 0::2].set(jnp.sin(pos * div))
    pe = pe.at[:, 1::2].set(jnp.cos(pos * div))
    p['pos'] = pe

    # TRLinear layers as rank-R sums of (sequence x feature) factors,
    # packed lane-dense:  feature factors concatenated along output lanes,
    # sequence factors hstack'ed over rank.
    scale_q = 1.0 / math.sqrt(float(E))
    b_qkv = nrm((NL, 3, R, D, HE), D * R)
    b_qkv = b_qkv.at[:, 0].multiply(scale_q)        # fold 1/sqrt(E) into q factors
    p['b_qkv'] = b_qkv.transpose(0, 3, 1, 2, 4).reshape(NL, D, 3 * R * HE)
    a_qkv = nrm((NL, 3, R, L, L), L)
    p['a_qkv'] = a_qkv.transpose(0, 1, 3, 2, 4).reshape(NL * 3, L, R * L)

    # LinearAttention proj_k / proj_v: head-mixing feature factor + (L -> K)
    c_kv = nrm((NL, 2, R, HE, HE), HE * R)
    p['c_kv'] = c_kv.transpose(0, 1, 3, 2, 4).reshape(NL * 2, HE, R * HE)
    d_kv = nrm((NL, 2, R, K, L), L)
    p['d_kv'] = d_kv.transpose(0, 1, 3, 2, 4).reshape(NL * 2, K, R * L)

    # attention out-projection
    b_o = nrm((NL, R, HE, D), HE * R)
    p['b_o'] = b_o.transpose(0, 2, 1, 3).reshape(NL, HE, R * D)
    a_o = nrm((NL, R, L, L), L)
    p['a_o'] = a_o.transpose(0, 2, 1, 3).reshape(NL, L, R * L)

    # FFN conv1 / conv2
    b_f1 = nrm((NL, R, D, F), D * R)
    p['b_f1'] = b_f1.transpose(0, 2, 1, 3).reshape(NL, D, R * F)
    a_f1 = nrm((NL, R, L, L), L)
    p['a_f1'] = a_f1.transpose(0, 2, 1, 3).reshape(NL, L, R * L)
    b_f2 = nrm((NL, R, F, D), F * R)
    p['b_f2'] = b_f2.transpose(0, 2, 1, 3).reshape(NL, F, R * D)
    a_f2 = nrm((NL, R, L, L), L)
    p['a_f2'] = a_f2.transpose(0, 2, 1, 3).reshape(NL, L, R * L)

    g = jnp.ones((1, 1, D), jnp.float32)
    b = jnp.zeros((1, 1, D), jnp.float32)
    p['ln'] = jnp.tile(jnp.concatenate([g, b, g, b], axis=0), (NL, 1, 1))  # (NL*4,1,D)
    p['ln_final'] = jnp.concatenate([g, b], axis=0)                        # (2,1,D)

    # OutputBlock (rul_estimation): per-step Linear(d_model, c_out)
    p['w_proj'] = nrm((D, CO), D)
    p['b_proj'] = jnp.zeros((1, CO), jnp.float32)
    return p


# ------------------------------- forward pass --------------------------------

_WEIGHT_NAMES = ['w_emb', 'pos', 'b_qkv', 'a_qkv', 'c_kv', 'd_kv', 'b_o', 'a_o',
                 'b_f1', 'a_f1', 'b_f2', 'a_f2', 'ln', 'ln_final',
                 'w_proj', 'b_proj']


def model_forward(params, cfg, x_enc, x_mark_enc, x_dec=None, x_mark_dec=None):
    B, L, C = x_enc.shape
    TF = x_mark_enc.shape[-1]
    D = cfg['d_model']; H = cfg['n_heads']; E = D // H
    CO = cfg['c_out']; CT = C + TF

    # one packed input per batch element -> one small DMA per grid step
    x_packed = jnp.concatenate([x_enc, x_mark_enc], axis=-1)   # (B, L, C+TF)

    kernel = functools.partial(
        _fused_forward_kernel,
        n_layers=cfg['e_layers'], rank=cfg['rank'], n_heads=H, d_head=E,
        seq_len=L, d_model=D, d_ff=cfg['d_ff'])

    weights = [params[n] for n in _WEIGHT_NAMES]

    def const_spec(arr):
        nd = arr.ndim
        return pl.BlockSpec(arr.shape, lambda b, _nd=nd: (0,) * _nd)

    in_specs = ([pl.BlockSpec((None, L, CT), lambda b: (b, 0, 0))]
                + [const_spec(w) for w in weights])

    return pl.pallas_call(
        kernel,
        out_shape=jax.ShapeDtypeStruct((B, L, CO), jnp.float32),
        grid=(B,),
        in_specs=in_specs,
        out_specs=pl.BlockSpec((None, L, CO), lambda b: (b, 0, 0)),
        compiler_params=pltpu.CompilerParams(
            dimension_semantics=("parallel",)),
    )(x_packed, *weights)


# ----------------------------------- main ------------------------------------

if __name__ == "__main__":
    cfg = dict(task_name='rul_estimation', seq_len=8, pred_len=0, enc_in=4,
               d_model=32, n_heads=4, d_lower=4, d_ff=64, e_layers=2,
               rank=2, c_out=1, time_feats=4, dropout=0.1, activation='relu',
               output_attention=False)
    key = jax.random.PRNGKey(0)
    kp, kx, km = jax.random.split(key, 3)
    params = init_params(kp, cfg)
    B, L = 2, cfg['seq_len']
    x_enc = jax.random.normal(kx, (B, L, cfg['enc_in']), jnp.float32)
    x_mark_enc = jax.random.normal(km, (B, L, cfg['time_feats']), jnp.float32)
    out = model_forward(params, cfg, x_enc, x_mark_enc, None, None)
    jax.block_until_ready(out)
    assert out.shape == (B, L, cfg['c_out'])
    assert bool(jnp.all(jnp.isfinite(out)))
    print("KERNEL_OK")
</pallas_src>

<mosaic_0001>
module attributes {stable_mosaic.version = 11 : i64} {
  func.func @_fused_forward_kernel(%arg0: i32, %arg1: memref<1x8x8xf32, #tpu.memory_space<vmem>>, %arg2: memref<24x32xf32, #tpu.memory_space<vmem>>, %arg3: memref<8x32xf32, #tpu.memory_space<vmem>>, %arg4: memref<2x32x192xf32, #tpu.memory_space<vmem>>, %arg5: memref<6x8x16xf32, #tpu.memory_space<vmem>>, %arg6: memref<4x32x64xf32, #tpu.memory_space<vmem>>, %arg7: memref<4x4x16xf32, #tpu.memory_space<vmem>>, %arg8: memref<2x32x64xf32, #tpu.memory_space<vmem>>, %arg9: memref<2x8x16xf32, #tpu.memory_space<vmem>>, %arg10: memref<2x32x128xf32, #tpu.memory_space<vmem>>, %arg11: memref<2x8x16xf32, #tpu.memory_space<vmem>>, %arg12: memref<2x64x64xf32, #tpu.memory_space<vmem>>, %arg13: memref<2x8x16xf32, #tpu.memory_space<vmem>>, %arg14: memref<8x1x32xf32, #tpu.memory_space<vmem>>, %arg15: memref<2x1x32xf32, #tpu.memory_space<vmem>>, %arg16: memref<32x1xf32, #tpu.memory_space<vmem>>, %arg17: memref<1x1xf32, #tpu.memory_space<vmem>>, %arg18: memref<1x8x1xf32, #tpu.memory_space<vmem>>) attributes {dimension_semantics = [#tpu.dimension_semantics<parallel>], iteration_bounds = array<i64: 2>, scalar_prefetch = 0 : i64, scratch_operands = 0 : i64, tpu.core_type = #tpu.core_type<tc>, window_params = [{transform_indices = @transform_0, window_bounds = array<i64: 1, 8, 8>}, {pipeline_mode = #tpu.pipeline_mode<synchronous>, transform_indices = @transform_1, window_bounds = array<i64: 24, 32>}, {pipeline_mode = #tpu.pipeline_mode<synchronous>, transform_indices = @transform_2, window_bounds = array<i64: 8, 32>}, {pipeline_mode = #tpu.pipeline_mode<synchronous>, transform_indices = @transform_3, window_bounds = array<i64: 2, 32, 192>}, {pipeline_mode = #tpu.pipeline_mode<synchronous>, transform_indices = @transform_4, window_bounds = array<i64: 6, 8, 16>}, {pipeline_mode = #tpu.pipeline_mode<synchronous>, transform_indices = @transform_5, window_bounds = array<i64: 4, 32, 64>}, {pipeline_mode = #tpu.pipeline_mode<synchronous>, transform_indices = @transform_6, window_bounds = array<i64: 4, 4, 16>}, {pipeline_mode = #tpu.pipeline_mode<synchronous>, transform_indices = @transform_7, window_bounds = array<i64: 2, 32, 64>}, {pipeline_mode = #tpu.pipeline_mode<synchronous>, transform_indices = @transform_8, window_bounds = array<i64: 2, 8, 16>}, {pipeline_mode = #tpu.pipeline_mode<synchronous>, transform_indices = @transform_9, window_bounds = array<i64: 2, 32, 128>}, {pipeline_mode = #tpu.pipeline_mode<synchronous>, transform_indices = @transform_10, window_bounds = array<i64: 2, 8, 16>}, {pipeline_mode = #tpu.pipeline_mode<synchronous>, transform_indices = @transform_11, window_bounds = array<i64: 2, 64, 64>}, {pipeline_mode = #tpu.pipeline_mode<synchronous>, transform_indices = @transform_12, window_bounds = array<i64: 2, 8, 16>}, {pipeline_mode = #tpu.pipeline_mode<synchronous>, transform_indices = @transform_13, window_bounds = array<i64: 8, 1, 32>}, {pipeline_mode = #tpu.pipeline_mode<synchronous>, transform_indices = @transform_14, window_bounds = array<i64: 2, 1, 32>}, {pipeline_mode = #tpu.pipeline_mode<synchronous>, transform_indices = @transform_15, window_bounds = array<i64: 32, 1>}, {pipeline_mode = #tpu.pipeline_mode<synchronous>, transform_indices = @transform_16, window_bounds = array<i64: 1, 1>}, {transform_indices = @transform_17, window_bounds = array<i64: 1, 8, 1>}]} {
    %c0 = arith.constant 0 : index
    %c0_0 = arith.constant 0 : index
    %c0_1 = arith.constant 0 : index
    %0 = vector.load %arg1[%c0, %c0_0, %c0_1] : memref<1x8x8xf32, #tpu.memory_space<vmem>>, vector<1x8x8xf32>
    %1 = vector.shape_cast %0 : vector<1x8x8xf32> to vector<8x8xf32>
    %c1_i32 = arith.constant 1 : i32
    %2 = tpu.dynamic_rotate %1 by %c1_i32 dim 0 : vector<8x8xf32>, i32 -> vector<8x8xf32>
    %c7_i32 = arith.constant 7 : i32
    %3 = tpu.dynamic_rotate %1 by %c7_i32 dim 0 : vector<8x8xf32>, i32 -> vector<8x8xf32>
    %4 = tpu.concatenate %2, %1, %3 in 1 : vector<8x8xf32>, vector<8x8xf32>, vector<8x8xf32> -> vector<8x24xf32>
    %c0_2 = arith.constant 0 : index
    %c0_3 = arith.constant 0 : index
    %5 = vector.load %arg2[%c0_2, %c0_3] : memref<24x32xf32, #tpu.memory_space<vmem>>, vector<24x32xf32>
    %cst = arith.constant dense<0.000000e+00> : vector<8x32xf32>
    %6 = tpu.matmul %4, %5, %cst {dimension_numbers = #tpu.dot_dimension_numbers<[1], [0], [0], [1], [0, 0, 1, 1], [], []>} : vector<8x24xf32>, vector<24x32xf32>, vector<8x32xf32> -> vector<8x32xf32>
    %c0_4 = arith.constant 0 : index
    %c0_5 = arith.constant 0 : index
    %7 = vector.load %arg3[%c0_4, %c0_5] : memref<8x32xf32, #tpu.memory_space<vmem>>, vector<8x32xf32>
    %8 = arith.addf %6, %7 : vector<8x32xf32>
    %c0_6 = arith.constant 0 : index
    %c0_7 = arith.constant 0 : index
    %c0_8 = arith.constant 0 : index
    %9 = vector.load %arg4[%c0_6, %c0_7, %c0_8] : memref<2x32x192xf32, #tpu.memory_space<vmem>>, vector<1x32x192xf32>
    %10 = vector.shape_cast %9 : vector<1x32x192xf32> to vector<32x192xf32>
    %cst_9 = arith.constant dense<0.000000e+00> : vector<8x192xf32>
    %11 = tpu.matmul %8, %10, %cst_9 {dimension_numbers = #tpu.dot_dimension_numbers<[1], [0], [0], [1], [0, 0, 1, 1], [], []>} : vector<8x32xf32>, vector<32x192xf32>, vector<8x192xf32> -> vector<8x192xf32>
    %c0_10 = arith.constant 0 : index
    %c0_11 = arith.constant 0 : index
    %c0_12 = arith.constant 0 : index
    %12 = vector.load %arg5[%c0_10, %c0_11, %c0_12] : memref<6x8x16xf32, #tpu.memory_space<vmem>>, vector<1x8x16xf32>
    %13 = vector.shape_cast %12 : vector<1x8x16xf32> to vector<8x16xf32>
    %14 = vector.extract_strided_slice %11 {offsets = [0, 0], sizes = [8, 32], strides = [1, 1]} : vector<8x192xf32> to vector<8x32xf32>
    %15 = vector.extract_strided_slice %11 {offsets = [0, 32], sizes = [8, 32], strides = [1, 1]} : vector<8x192xf32> to vector<8x32xf32>
    %16 = tpu.concatenate %14, %15 in 0 : vector<8x32xf32>, vector<8x32xf32> -> vector<16x32xf32>
    %cst_13 = arith.constant dense<0.000000e+00> : vector<8x32xf32>
    %17 = tpu.matmul %13, %16, %cst_13 {dimension_numbers = #tpu.dot_dimension_numbers<[1], [0], [0], [1], [0, 0, 1, 1], [], []>} : vector<8x16xf32>, vector<16x32xf32>, vector<8x32xf32> -> vector<8x32xf32>
    %c1 = arith.constant 1 : index
    %c0_14 = arith.constant 0 : index
    %c0_15 = arith.constant 0 : index
    %18 = vector.load %arg5[%c1, %c0_14, %c0_15] : memref<6x8x16xf32, #tpu.memory_space<vmem>>, vector<1x8x16xf32>
    %19 = vector.shape_cast %18 : vector<1x8x16xf32> to vector<8x16xf32>
    %20 = vector.extract_strided_slice %11 {offsets = [0, 64], sizes = [8, 32], strides = [1, 1]} : vector<8x192xf32> to vector<8x32xf32>
    %21 = vector.extract_strided_slice %11 {offsets = [0, 96], sizes = [8, 32], strides = [1, 1]} : vector<8x192xf32> to vector<8x32xf32>
    %22 = tpu.concatenate %20, %21 in 0 : vector<8x32xf32>, vector<8x32xf32> -> vector<16x32xf32>
    %cst_16 = arith.constant dense<0.000000e+00> : vector<8x32xf32>
    %23 = tpu.matmul %19, %22, %cst_16 {dimension_numbers = #tpu.dot_dimension_numbers<[1], [0], [0], [1], [0, 0, 1, 1], [], []>} : vector<8x16xf32>, vector<16x32xf32>, vector<8x32xf32> -> vector<8x32xf32>
    %c2 = arith.constant 2 : index
    %c0_17 = arith.constant 0 : index
    %c0_18 = arith.constant 0 : index
    %24 = vector.load %arg5[%c2, %c0_17, %c0_18] : memref<6x8x16xf32, #tpu.memory_space<vmem>>, vector<1x8x16xf32>
    %25 = vector.shape_cast %24 : vector<1x8x16xf32> to vector<8x16xf32>
    %26 = vector.extract_strided_slice %11 {offsets = [0, 128], sizes = [8, 32], strides = [1, 1]} : vector<8x192xf32> to vector<8x32xf32>
    %27 = vector.extract_strided_slice %11 {offsets = [0, 160], sizes = [8, 32], strides = [1, 1]} : vector<8x192xf32> to vector<8x32xf32>
    %28 = tpu.concatenate %26, %27 in 0 : vector<8x32xf32>, vector<8x32xf32> -> vector<16x32xf32>
    %cst_19 = arith.constant dense<0.000000e+00> : vector<8x32xf32>
    %29 = tpu.matmul %25, %28, %cst_19 {dimension_numbers = #tpu.dot_dimension_numbers<[1], [0], [0], [1], [0, 0, 1, 1], [], []>} : vector<8x16xf32>, vector<16x32xf32>, vector<8x32xf32> -> vector<8x32xf32>
    %c0_20 = arith.constant 0 : index
    %c0_21 = arith.constant 0 : index
    %c0_22 = arith.constant 0 : index
    %30 = vector.load %arg6[%c0_20, %c0_21, %c0_22] : memref<4x32x64xf32, #tpu.memory_space<vmem>>, vector<1x32x64xf32>
    %31 = vector.shape_cast %30 : vector<1x32x64xf32> to vector<32x64xf32>
    %cst_23 = arith.constant dense<0.000000e+00> : vector<8x64xf32>
    %32 = tpu.matmul %23, %31, %cst_23 {dimension_numbers = #tpu.dot_dimension_numbers<[1], [0], [0], [1], [0, 0, 1, 1], [], []>} : vector<8x32xf32>, vector<32x64xf32>, vector<8x64xf32> -> vector<8x64xf32>
    %c0_24 = arith.constant 0 : index
    %c0_25 = arith.constant 0 : index
    %c0_26 = arith.constant 0 : index
    %33 = vector.load %arg7[%c0_24, %c0_25, %c0_26] : memref<4x4x16xf32, #tpu.memory_space<vmem>>, vector<1x4x16xf32>
    %34 = vector.shape_cast %33 : vector<1x4x16xf32> to vector<4x16xf32>
    %35 = vector.extract_strided_slice %32 {offsets = [0, 0], sizes = [8, 32], strides = [1, 1]} : vector<8x64xf32> to vector<8x32xf32>
    %36 = vector.extract_strided_slice %32 {offsets = [0, 32], sizes = [8, 32], strides = [1, 1]} : vector<8x64xf32> to vector<8x32xf32>
    %37 = tpu.concatenate %35, %36 in 0 : vector<8x32xf32>, vector<8x32xf32> -> vector<16x32xf32>
    %cst_27 = arith.constant dense<0.000000e+00> : vector<4x32xf32>
    %38 = tpu.matmul %34, %37, %cst_27 {dimension_numbers = #tpu.dot_dimension_numbers<[1], [0], [0], [1], [0, 0, 1, 1], [], []>} : vector<4x16xf32>, vector<16x32xf32>, vector<4x32xf32> -> vector<4x32xf32>
    %c1_28 = arith.constant 1 : index
    %c0_29 = arith.constant 0 : index
    %c0_30 = arith.constant 0 : index
    %39 = vector.load %arg6[%c1_28, %c0_29, %c0_30] : memref<4x32x64xf32, #tpu.memory_space<vmem>>, vector<1x32x64xf32>
    %40 = vector.shape_cast %39 : vector<1x32x64xf32> to vector<32x64xf32>
    %cst_31 = arith.constant dense<0.000000e+00> : vector<8x64xf32>
    %41 = tpu.matmul %29, %40, %cst_31 {dimension_numbers = #tpu.dot_dimension_numbers<[1], [0], [0], [1], [0, 0, 1, 1], [], []>} : vector<8x32xf32>, vector<32x64xf32>, vector<8x64xf32> -> vector<8x64xf32>
    %c1_32 = arith.constant 1 : index
    %c0_33 = arith.constant 0 : index
    %c0_34 = arith.constant 0 : index
    %42 = vector.load %arg7[%c1_32, %c0_33, %c0_34] : memref<4x4x16xf32, #tpu.memory_space<vmem>>, vector<1x4x16xf32>
    %43 = vector.shape_cast %42 : vector<1x4x16xf32> to vector<4x16xf32>
    %44 = vector.extract_strided_slice %41 {offsets = [0, 0], sizes = [8, 32], strides = [1, 1]} : vector<8x64xf32> to vector<8x32xf32>
    %45 = vector.extract_strided_slice %41 {offsets = [0, 32], sizes = [8, 32], strides = [1, 1]} : vector<8x64xf32> to vector<8x32xf32>
    %46 = tpu.concatenate %44, %45 in 0 : vector<8x32xf32>, vector<8x32xf32> -> vector<16x32xf32>
    %cst_35 = arith.constant dense<0.000000e+00> : vector<4x32xf32>
    %47 = tpu.matmul %43, %46, %cst_35 {dimension_numbers = #tpu.dot_dimension_numbers<[1], [0], [0], [1], [0, 0, 1, 1], [], []>} : vector<4x16xf32>, vector<16x32xf32>, vector<4x32xf32> -> vector<4x32xf32>
    %48 = vector.extract_strided_slice %17 {offsets = [0, 0], sizes = [8, 8], strides = [1, 1]} : vector<8x32xf32> to vector<8x8xf32>
    %49 = vector.extract_strided_slice %17 {offsets = [0, 8], sizes = [8, 8], strides = [1, 1]} : vector<8x32xf32> to vector<8x8xf32>
    %50 = vector.extract_strided_slice %17 {offsets = [0, 16], sizes = [8, 8], strides = [1, 1]} : vector<8x32xf32> to vector<8x8xf32>
    %51 = vector.extract_strided_slice %17 {offsets = [0, 24], sizes = [8, 8], strides = [1, 1]} : vector<8x32xf32> to vector<8x8xf32>
    %52 = vector.shape_cast %48 : vector<8x8xf32> to vector<1x8x8xf32>
    %53 = vector.shape_cast %49 : vector<8x8xf32> to vector<1x8x8xf32>
    %54 = vector.shape_cast %50 : vector<8x8xf32> to vector<1x8x8xf32>
    %55 = vector.shape_cast %51 : vector<8x8xf32> to vector<1x8x8xf32>
    %56 = tpu.concatenate %52, %53, %54, %55 in 0 : vector<1x8x8xf32>, vector<1x8x8xf32>, vector<1x8x8xf32>, vector<1x8x8xf32> -> vector<4x8x8xf32>
    %57 = vector.extract_strided_slice %38 {offsets = [0, 0], sizes = [4, 8], strides = [1, 1]} : vector<4x32xf32> to vector<4x8xf32>
    %58 = vector.extract_strided_slice %38 {offsets = [0, 8], sizes = [4, 8], strides = [1, 1]} : vector<4x32xf32> to vector<4x8xf32>
    %59 = vector.extract_strided_slice %38 {offsets = [0, 16], sizes = [4, 8], strides = [1, 1]} : vector<4x32xf32> to vector<4x8xf32>
    %60 = vector.extract_strided_slice %38 {offsets = [0, 24], sizes = [4, 8], strides = [1, 1]} : vector<4x32xf32> to vector<4x8xf32>
    %61 = vector.shape_cast %57 : vector<4x8xf32> to vector<1x4x8xf32>
    %62 = vector.shape_cast %58 : vector<4x8xf32> to vector<1x4x8xf32>
    %63 = vector.shape_cast %59 : vector<4x8xf32> to vector<1x4x8xf32>
    %64 = vector.shape_cast %60 : vector<4x8xf32> to vector<1x4x8xf32>
    %65 = tpu.concatenate %61, %62, %63, %64 in 0 : vector<1x4x8xf32>, vector<1x4x8xf32>, vector<1x4x8xf32>, vector<1x4x8xf32> -> vector<4x4x8xf32>
    %66 = vector.extract_strided_slice %47 {offsets = [0, 0], sizes = [4, 8], strides = [1, 1]} : vector<4x32xf32> to vector<4x8xf32>
    %67 = vector.extract_strided_slice %47 {offsets = [0, 8], sizes = [4, 8], strides = [1, 1]} : vector<4x32xf32> to vector<4x8xf32>
    %68 = vector.extract_strided_slice %47 {offsets = [0, 16], sizes = [4, 8], strides = [1, 1]} : vector<4x32xf32> to vector<4x8xf32>
    %69 = vector.extract_strided_slice %47 {offsets = [0, 24], sizes = [4, 8], strides = [1, 1]} : vector<4x32xf32> to vector<4x8xf32>
    %70 = vector.shape_cast %66 : vector<4x8xf32> to vector<1x4x8xf32>
    %71 = vector.shape_cast %67 : vector<4x8xf32> to vector<1x4x8xf32>
    %72 = vector.shape_cast %68 : vector<4x8xf32> to vector<1x4x8xf32>
    %73 = vector.shape_cast %69 : vector<4x8xf32> to vector<1x4x8xf32>
    %74 = tpu.concatenate %70, %71, %72, %73 in 0 : vector<1x4x8xf32>, vector<1x4x8xf32>, vector<1x4x8xf32>, vector<1x4x8xf32> -> vector<4x4x8xf32>
    %cst_36 = arith.constant dense<0.000000e+00> : vector<4x8x4xf32>
    %75 = tpu.matmul %56, %65, %cst_36 {dimension_numbers = #tpu.dot_dimension_numbers<[2], [2], [1], [1], [0, 0, 0, 1, 1, 1], [0], [0]>} : vector<4x8x8xf32>, vector<4x4x8xf32>, vector<4x8x4xf32> -> vector<4x8x4xf32>
    %76 = math.exp %75 : vector<4x8x4xf32>
    %cst_37 = arith.constant dense<0.000000e+00> : vector<4x8xf32>
    %77 = vector.multi_reduction <add>, %76, %cst_37 [2] : vector<4x8x4xf32> to vector<4x8xf32>
    %78 = vector.shape_cast %77 : vector<4x8xf32> to vector<4x8x1xf32>
    %79 = tpu.reciprocal %78 {approx = true} : vector<4x8x1xf32> -> vector<4x8x1xf32>
    %80 = vector.broadcast %79 : vector<4x8x1xf32> to vector<4x8x4xf32>
    %81 = arith.mulf %76, %80 : vector<4x8x4xf32>
    %cst_38 = arith.constant dense<0.000000e+00> : vector<4x8x8xf32>
    %82 = tpu.matmul %81, %74, %cst_38 {dimension_numbers = #tpu.dot_dimension_numbers<[2], [1], [1], [2], [0, 0, 0, 1, 1, 2], [0], [0]>} : vector<4x8x4xf32>, vector<4x4x8xf32>, vector<4x8x8xf32> -> vector<4x8x8xf32>
    %83 = vector.extract_strided_slice %82 {offsets = [0, 0, 0], sizes = [1, 8, 8], strides = [1, 1, 1]} : vector<4x8x8xf32> to vector<1x8x8xf32>
    %84 = vector.shape_cast %83 : vector<1x8x8xf32> to vector<8x8xf32>
    %85 = vector.extract_strided_slice %82 {offsets = [1, 0, 0], sizes = [1, 8, 8], strides = [1, 1, 1]} : vector<4x8x8xf32> to vector<1x8x8xf32>
    %86 = vector.shape_cast %85 : vector<1x8x8xf32> to vector<8x8xf32>
    %87 = vector.extract_strided_slice %82 {offsets = [2, 0, 0], sizes = [1, 8, 8], strides = [1, 1, 1]} : vector<4x8x8xf32> to vector<1x8x8xf32>
    %88 = vector.shape_cast %87 : vector<1x8x8xf32> to vector<8x8xf32>
    %89 = vector.extract_strided_slice %82 {offsets = [3, 0, 0], sizes = [1, 8, 8], strides = [1, 1, 1]} : vector<4x8x8xf32> to vector<1x8x8xf32>
    %90 = vector.shape_cast %89 : vector<1x8x8xf32> to vector<8x8xf32>
    %91 = tpu.concatenate %84, %86, %88, %90 in 1 : vector<8x8xf32>, vector<8x8xf32>, vector<8x8xf32>, vector<8x8xf32> -> vector<8x32xf32>
    %c0_39 = arith.constant 0 : index
    %c0_40 = arith.constant 0 : index
    %c0_41 = arith.constant 0 : index
    %92 = vector.load %arg8[%c0_39, %c0_40, %c0_41] : memref<2x32x64xf32, #tpu.memory_space<vmem>>, vector<1x32x64xf32>
    %93 = vector.shape_cast %92 : vector<1x32x64xf32> to vector<32x64xf32>
    %cst_42 = arith.constant dense<0.000000e+00> : vector<8x64xf32>
    %94 = tpu.matmul %91, %93, %cst_42 {dimension_numbers = #tpu.dot_dimension_numbers<[1], [0], [0], [1], [0, 0, 1, 1], [], []>} : vector<8x32xf32>, vector<32x64xf32>, vector<8x64xf32> -> vector<8x64xf32>
    %c0_43 = arith.constant 0 : index
    %c0_44 = arith.constant 0 : index
    %c0_45 = arith.constant 0 : index
    %95 = vector.load %arg9[%c0_43, %c0_44, %c0_45] : memref<2x8x16xf32, #tpu.memory_space<vmem>>, vector<1x8x16xf32>
    %96 = vector.shape_cast %95 : vector<1x8x16xf32> to vector<8x16xf32>
    %97 = vector.extract_strided_slice %94 {offsets = [0, 0], sizes = [8, 32], strides = [1, 1]} : vector<8x64xf32> to vector<8x32xf32>
    %98 = vector.extract_strided_slice %94 {offsets = [0, 32], sizes = [8, 32], strides = [1, 1]} : vector<8x64xf32> to vector<8x32xf32>
    %99 = tpu.concatenate %97, %98 in 0 : vector<8x32xf32>, vector<8x32xf32> -> vector<16x32xf32>
    %cst_46 = arith.constant dense<0.000000e+00> : vector<8x32xf32>
    %100 = tpu.matmul %96, %99, %cst_46 {dimension_numbers = #tpu.dot_dimension_numbers<[1], [0], [0], [1], [0, 0, 1, 1], [], []>} : vector<8x16xf32>, vector<16x32xf32>, vector<8x32xf32> -> vector<8x32xf32>
    %101 = arith.addf %8, %100 : vector<8x32xf32>
    %c0_47 = arith.constant 0 : index
    %c0_48 = arith.constant 0 : index
    %c0_49 = arith.constant 0 : index
    %102 = vector.load %arg14[%c0_47, %c0_48, %c0_49] : memref<8x1x32xf32, #tpu.memory_space<vmem>>, vector<1x1x32xf32>
    %103 = vector.shape_cast %102 : vector<1x1x32xf32> to vector<1x32xf32>
    %c1_50 = arith.constant 1 : index
    %c0_51 = arith.constant 0 : index
    %c0_52 = arith.constant 0 : index
    %104 = vector.load %arg14[%c1_50, %c0_51, %c0_52] : memref<8x1x32xf32, #tpu.memory_space<vmem>>, vector<1x1x32xf32>
    %105 = vector.shape_cast %104 : vector<1x1x32xf32> to vector<1x32xf32>
    %cst_53 = arith.constant dense<0.000000e+00> : vector<8xf32>
    %106 = vector.multi_reduction <add>, %101, %cst_53 [1] : vector<8x32xf32> to vector<8xf32>
    %107 = vector.shape_cast %106 : vector<8xf32> to vector<8x1xf32>
    %cst_54 = arith.constant 3.200000e+01 : f32
    %108 = vector.broadcast %cst_54 : f32 to vector<8x1xf32>
    %109 = arith.divf %107, %108 : vector<8x1xf32>
    %110 = vector.broadcast %109 : vector<8x1xf32> to vector<8x32xf32>
    %111 = arith.subf %101, %110 : vector<8x32xf32>
    %112 = arith.mulf %111, %111 : vector<8x32xf32>
    %cst_55 = arith.constant dense<0.000000e+00> : vector<8xf32>
    %113 = vector.multi_reduction <add>, %112, %cst_55 [1] : vector<8x32xf32> to vector<8xf32>
    %114 = vector.shape_cast %113 : vector<8xf32> to vector<8x1xf32>
    %cst_56 = arith.constant 3.200000e+01 : f32
    %115 = vector.broadcast %cst_56 : f32 to vector<8x1xf32>
    %116 = arith.divf %114, %115 : vector<8x1xf32>
    %cst_57 = arith.constant 9.99999974E-6 : f32
    %117 = vector.broadcast %cst_57 : f32 to vector<8x1xf32>
    %118 = arith.addf %116, %117 : vector<8x1xf32>
    %119 = math.rsqrt %118 : vector<8x1xf32>
    %120 = vector.broadcast %119 : vector<8x1xf32> to vector<8x32xf32>
    %121 = arith.mulf %111, %120 : vector<8x32xf32>
    %122 = vector.broadcast %103 : vector<1x32xf32> to vector<8x32xf32>
    %123 = arith.mulf %121, %122 : vector<8x32xf32>
    %124 = vector.broadcast %105 : vector<1x32xf32> to vector<8x32xf32>
    %125 = arith.addf %123, %124 : vector<8x32xf32>
    %c0_58 = arith.constant 0 : index
    %c0_59 = arith.constant 0 : index
    %c0_60 = arith.constant 0 : index
    %126 = vector.load %arg10[%c0_58, %c0_59, %c0_60] : memref<2x32x128xf32, #tpu.memory_space<vmem>>, vector<1x32x128xf32>
    %127 = vector.shape_cast %126 : vector<1x32x128xf32> to vector<32x128xf32>
    %cst_61 = arith.constant dense<0.000000e+00> : vector<8x128xf32>
    %128 = tpu.matmul %125, %127, %cst_61 {dimension_numbers = #tpu.dot_dimension_numbers<[1], [0], [0], [1], [0, 0, 1, 1], [], []>} : vector<8x32xf32>, vector<32x128xf32>, vector<8x128xf32> -> vector<8x128xf32>
    %c0_62 = arith.constant 0 : index
    %c0_63 = arith.constant 0 : index
    %c0_64 = arith.constant 0 : index
    %129 = vector.load %arg11[%c0_62, %c0_63, %c0_64] : memref<2x8x16xf32, #tpu.memory_space<vmem>>, vector<1x8x16xf32>
    %130 = vector.shape_cast %129 : vector<1x8x16xf32> to vector<8x16xf32>
    %131 = vector.extract_strided_slice %128 {offsets = [0, 0], sizes = [8, 64], strides = [1, 1]} : vector<8x128xf32> to vector<8x64xf32>
    %132 = vector.extract_strided_slice %128 {offsets = [0, 64], sizes = [8, 64], strides = [1, 1]} : vector<8x128xf32> to vector<8x64xf32>
    %133 = tpu.concatenate %131, %132 in 0 : vector<8x64xf32>, vector<8x64xf32> -> vector<16x64xf32>
    %cst_65 = arith.constant dense<0.000000e+00> : vector<8x64xf32>
    %134 = tpu.matmul %130, %133, %cst_65 {dimension_numbers = #tpu.dot_dimension_numbers<[1], [0], [0], [1], [0, 0, 1, 1], [], []>} : vector<8x16xf32>, vector<16x64xf32>, vector<8x64xf32> -> vector<8x64xf32>
    %cst_66 = arith.constant 0.000000e+00 : f32
    %135 = vector.broadcast %cst_66 : f32 to vector<8x64xf32>
    %136 = arith.maximumf %134, %135 : vector<8x64xf32>
    %c0_67 = arith.constant 0 : index
    %c0_68 = arith.constant 0 : index
    %c0_69 = arith.constant 0 : index
    %137 = vector.load %arg12[%c0_67, %c0_68, %c0_69] : memref<2x64x64xf32, #tpu.memory_space<vmem>>, vector<1x64x64xf32>
    %138 = vector.shape_cast %137 : vector<1x64x64xf32> to vector<64x64xf32>
    %cst_70 = arith.constant dense<0.000000e+00> : vector<8x64xf32>
    %139 = tpu.matmul %136, %138, %cst_70 {dimension_numbers = #tpu.dot_dimension_numbers<[1], [0], [0], [1], [0, 0, 1, 1], [], []>} : vector<8x64xf32>, vector<64x64xf32>, vector<8x64xf32> -> vector<8x64xf32>
    %c0_71 = arith.constant 0 : index
    %c0_72 = arith.constant 0 : index
    %c0_73 = arith.constant 0 : index
    %140 = vector.load %arg13[%c0_71, %c0_72, %c0_73] : memref<2x8x16xf32, #tpu.memory_space<vmem>>, vector<1x8x16xf32>
    %141 = vector.shape_cast %140 : vector<1x8x16xf32> to vector<8x16xf32>
    %142 = vector.extract_strided_slice %139 {offsets = [0, 0], sizes = [8, 32], strides = [1, 1]} : vector<8x64xf32> to vector<8x32xf32>
    %143 = vector.extract_strided_slice %139 {offsets = [0, 32], sizes = [8, 32], strides = [1, 1]} : vector<8x64xf32> to vector<8x32xf32>
    %144 = tpu.concatenate %142, %143 in 0 : vector<8x32xf32>, vector<8x32xf32> -> vector<16x32xf32>
    %cst_74 = arith.constant dense<0.000000e+00> : vector<8x32xf32>
    %145 = tpu.matmul %141, %144, %cst_74 {dimension_numbers = #tpu.dot_dimension_numbers<[1], [0], [0], [1], [0, 0, 1, 1], [], []>} : vector<8x16xf32>, vector<16x32xf32>, vector<8x32xf32> -> vector<8x32xf32>
    %146 = arith.addf %125, %145 : vector<8x32xf32>
    %c2_75 = arith.constant 2 : index
    %c0_76 = arith.constant 0 : index
    %c0_77 = arith.constant 0 : index
    %147 = vector.load %arg14[%c2_75, %c0_76, %c0_77] : memref<8x1x32xf32, #tpu.memory_space<vmem>>, vector<1x1x32xf32>
    %148 = vector.shape_cast %147 : vector<1x1x32xf32> to vector<1x32xf32>
    %c3 = arith.constant 3 : index
    %c0_78 = arith.constant 0 : index
    %c0_79 = arith.constant 0 : index
    %149 = vector.load %arg14[%c3, %c0_78, %c0_79] : memref<8x1x32xf32, #tpu.memory_space<vmem>>, vector<1x1x32xf32>
    %150 = vector.shape_cast %149 : vector<1x1x32xf32> to vector<1x32xf32>
    %cst_80 = arith.constant dense<0.000000e+00> : vector<8xf32>
    %151 = vector.multi_reduction <add>, %146, %cst_80 [1] : vector<8x32xf32> to vector<8xf32>
    %152 = vector.shape_cast %151 : vector<8xf32> to vector<8x1xf32>
    %cst_81 = arith.constant 3.200000e+01 : f32
    %153 = vector.broadcast %cst_81 : f32 to vector<8x1xf32>
    %154 = arith.divf %152, %153 : vector<8x1xf32>
    %155 = vector.broadcast %154 : vector<8x1xf32> to vector<8x32xf32>
    %156 = arith.subf %146, %155 : vector<8x32xf32>
    %157 = arith.mulf %156, %156 : vector<8x32xf32>
    %cst_82 = arith.constant dense<0.000000e+00> : vector<8xf32>
    %158 = vector.multi_reduction <add>, %157, %cst_82 [1] : vector<8x32xf32> to vector<8xf32>
    %159 = vector.shape_cast %158 : vector<8xf32> to vector<8x1xf32>
    %cst_83 = arith.constant 3.200000e+01 : f32
    %160 = vector.broadcast %cst_83 : f32 to vector<8x1xf32>
    %161 = arith.divf %159, %160 : vector<8x1xf32>
    %cst_84 = arith.constant 9.99999974E-6 : f32
    %162 = vector.broadcast %cst_84 : f32 to vector<8x1xf32>
    %163 = arith.addf %161, %162 : vector<8x1xf32>
    %164 = math.rsqrt %163 : vector<8x1xf32>
    %165 = vector.broadcast %164 : vector<8x1xf32> to vector<8x32xf32>
    %166 = arith.mulf %156, %165 : vector<8x32xf32>
    %167 = vector.broadcast %148 : vector<1x32xf32> to vector<8x32xf32>
    %168 = arith.mulf %166, %167 : vector<8x32xf32>
    %169 = vector.broadcast %150 : vector<1x32xf32> to vector<8x32xf32>
    %170 = arith.addf %168, %169 : vector<8x32xf32>
    %c1_85 = arith.constant 1 : index
    %c0_86 = arith.constant 0 : index
    %c0_87 = arith.constant 0 : index
    %171 = vector.load %arg4[%c1_85, %c0_86, %c0_87] : memref<2x32x192xf32, #tpu.memory_space<vmem>>, vector<1x32x192xf32>
    %172 = vector.shape_cast %171 : vector<1x32x192xf32> to vector<32x192xf32>
    %cst_88 = arith.constant dense<0.000000e+00> : vector<8x192xf32>
    %173 = tpu.matmul %170, %172, %cst_88 {dimension_numbers = #tpu.dot_dimension_numbers<[1], [0], [0], [1], [0, 0, 1, 1], [], []>} : vector<8x32xf32>, vector<32x192xf32>, vector<8x192xf32> -> vector<8x192xf32>
    %c3_89 = arith.constant 3 : index
    %c0_90 = arith.constant 0 : index
    %c0_91 = arith.constant 0 : index
    %174 = vector.load %arg5[%c3_89, %c0_90, %c0_91] : memref<6x8x16xf32, #tpu.memory_space<vmem>>, vector<1x8x16xf32>
    %175 = vector.shape_cast %174 : vector<1x8x16xf32> to vector<8x16xf32>
    %176 = vector.extract_strided_slice %173 {offsets = [0, 0], sizes = [8, 32], strides = [1, 1]} : vector<8x192xf32> to vector<8x32xf32>
    %177 = vector.extract_strided_slice %173 {offsets = [0, 32], sizes = [8, 32], strides = [1, 1]} : vector<8x192xf32> to vector<8x32xf32>
    %178 = tpu.concatenate %176, %177 in 0 : vector<8x32xf32>, vector<8x32xf32> -> vector<16x32xf32>
    %cst_92 = arith.constant dense<0.000000e+00> : vector<8x32xf32>
    %179 = tpu.matmul %175, %178, %cst_92 {dimension_numbers = #tpu.dot_dimension_numbers<[1], [0], [0], [1], [0, 0, 1, 1], [], []>} : vector<8x16xf32>, vector<16x32xf32>, vector<8x32xf32> -> vector<8x32xf32>
    %c4 = arith.constant 4 : index
    %c0_93 = arith.constant 0 : index
    %c0_94 = arith.constant 0 : index
    %180 = vector.load %arg5[%c4, %c0_93, %c0_94] : memref<6x8x16xf32, #tpu.memory_space<vmem>>, vector<1x8x16xf32>
    %181 = vector.shape_cast %180 : vector<1x8x16xf32> to vector<8x16xf32>
    %182 = vector.extract_strided_slice %173 {offsets = [0, 64], sizes = [8, 32], strides = [1, 1]} : vector<8x192xf32> to vector<8x32xf32>
    %183 = vector.extract_strided_slice %173 {offsets = [0, 96], sizes = [8, 32], strides = [1, 1]} : vector<8x192xf32> to vector<8x32xf32>
    %184 = tpu.concatenate %182, %183 in 0 : vector<8x32xf32>, vector<8x32xf32> -> vector<16x32xf32>
    %cst_95 = arith.constant dense<0.000000e+00> : vector<8x32xf32>
    %185 = tpu.matmul %181, %184, %cst_95 {dimension_numbers = #tpu.dot_dimension_numbers<[1], [0], [0], [1], [0, 0, 1, 1], [], []>} : vector<8x16xf32>, vector<16x32xf32>, vector<8x32xf32> -> vector<8x32xf32>
    %c5 = arith.constant 5 : index
    %c0_96 = arith.constant 0 : index
    %c0_97 = arith.constant 0 : index
    %186 = vector.load %arg5[%c5, %c0_96, %c0_97] : memref<6x8x16xf32, #tpu.memory_space<vmem>>, vector<1x8x16xf32>
    %187 = vector.shape_cast %186 : vector<1x8x16xf32> to vector<8x16xf32>
    %188 = vector.extract_strided_slice %173 {offsets = [0, 128], sizes = [8, 32], strides = [1, 1]} : vector<8x192xf32> to vector<8x32xf32>
    %189 = vector.extract_strided_slice %173 {offsets = [0, 160], sizes = [8, 32], strides = [1, 1]} : vector<8x192xf32> to vector<8x32xf32>
    %190 = tpu.concatenate %188, %189 in 0 : vector<8x32xf32>, vector<8x32xf32> -> vector<16x32xf32>
    %cst_98 = arith.constant dense<0.000000e+00> : vector<8x32xf32>
    %191 = tpu.matmul %187, %190, %cst_98 {dimension_numbers = #tpu.dot_dimension_numbers<[1], [0], [0], [1], [0, 0, 1, 1], [], []>} : vector<8x16xf32>, vector<16x32xf32>, vector<8x32xf32> -> vector<8x32xf32>
    %c2_99 = arith.constant 2 : index
    %c0_100 = arith.constant 0 : index
    %c0_101 = arith.constant 0 : index
    %192 = vector.load %arg6[%c2_99, %c0_100, %c0_101] : memref<4x32x64xf32, #tpu.memory_space<vmem>>, vector<1x32x64xf32>
    %193 = vector.shape_cast %192 : vector<1x32x64xf32> to vector<32x64xf32>
    %cst_102 = arith.constant dense<0.000000e+00> : vector<8x64xf32>
    %194 = tpu.matmul %185, %193, %cst_102 {dimension_numbers = #tpu.dot_dimension_numbers<[1], [0], [0], [1], [0, 0, 1, 1], [], []>} : vector<8x32xf32>, vector<32x64xf32>, vector<8x64xf32> -> vector<8x64xf32>
    %c2_103 = arith.constant 2 : index
    %c0_104 = arith.constant 0 : index
    %c0_105 = arith.constant 0 : index
    %195 = vector.load %arg7[%c2_103, %c0_104, %c0_105] : memref<4x4x16xf32, #tpu.memory_space<vmem>>, vector<1x4x16xf32>
    %196 = vector.shape_cast %195 : vector<1x4x16xf32> to vector<4x16xf32>
    %197 = vector.extract_strided_slice %194 {offsets = [0, 0], sizes = [8, 32], strides = [1, 1]} : vector<8x64xf32> to vector<8x32xf32>
    %198 = vector.extract_strided_slice %194 {offsets = [0, 32], sizes = [8, 32], strides = [1, 1]} : vector<8x64xf32> to vector<8x32xf32>
    %199 = tpu.concatenate %197, %198 in 0 : vector<8x32xf32>, vector<8x32xf32> -> vector<16x32xf32>
    %cst_106 = arith.constant dense<0.000000e+00> : vector<4x32xf32>
    %200 = tpu.matmul %196, %199, %cst_106 {dimension_numbers = #tpu.dot_dimension_numbers<[1], [0], [0], [1], [0, 0, 1, 1], [], []>} : vector<4x16xf32>, vector<16x32xf32>, vector<4x32xf32> -> vector<4x32xf32>
    %c3_107 = arith.constant 3 : index
    %c0_108 = arith.constant 0 : index
    %c0_109 = arith.constant 0 : index
    %201 = vector.load %arg6[%c3_107, %c0_108, %c0_109] : memref<4x32x64xf32, #tpu.memory_space<vmem>>, vector<1x32x64xf32>
    %202 = vector.shape_cast %201 : vector<1x32x64xf32> to vector<32x64xf32>
    %cst_110 = arith.constant dense<0.000000e+00> : vector<8x64xf32>
    %203 = tpu.matmul %191, %202, %cst_110 {dimension_numbers = #tpu.dot_dimension_numbers<[1], [0], [0], [1], [0, 0, 1, 1], [], []>} : vector<8x32xf32>, vector<32x64xf32>, vector<8x64xf32> -> vector<8x64xf32>
    %c3_111 = arith.constant 3 : index
    %c0_112 = arith.constant 0 : index
    %c0_113 = arith.constant 0 : index
    %204 = vector.load %arg7[%c3_111, %c0_112, %c0_113] : memref<4x4x16xf32, #tpu.memory_space<vmem>>, vector<1x4x16xf32>
    %205 = vector.shape_cast %204 : vector<1x4x16xf32> to vector<4x16xf32>
    %206 = vector.extract_strided_slice %203 {offsets = [0, 0], sizes = [8, 32], strides = [1, 1]} : vector<8x64xf32> to vector<8x32xf32>
    %207 = vector.extract_strided_slice %203 {offsets = [0, 32], sizes = [8, 32], strides = [1, 1]} : vector<8x64xf32> to vector<8x32xf32>
    %208 = tpu.concatenate %206, %207 in 0 : vector<8x32xf32>, vector<8x32xf32> -> vector<16x32xf32>
    %cst_114 = arith.constant dense<0.000000e+00> : vector<4x32xf32>
    %209 = tpu.matmul %205, %208, %cst_114 {dimension_numbers = #tpu.dot_dimension_numbers<[1], [0], [0], [1], [0, 0, 1, 1], [], []>} : vector<4x16xf32>, vector<16x32xf32>, vector<4x32xf32> -> vector<4x32xf32>
    %210 = vector.extract_strided_slice %179 {offsets = [0, 0], sizes = [8, 8], strides = [1, 1]} : vector<8x32xf32> to vector<8x8xf32>
    %211 = vector.extract_strided_slice %179 {offsets = [0, 8], sizes = [8, 8], strides = [1, 1]} : vector<8x32xf32> to vector<8x8xf32>
    %212 = vector.extract_strided_slice %179 {offsets = [0, 16], sizes = [8, 8], strides = [1, 1]} : vector<8x32xf32> to vector<8x8xf32>
    %213 = vector.extract_strided_slice %179 {offsets = [0, 24], sizes = [8, 8], strides = [1, 1]} : vector<8x32xf32> to vector<8x8xf32>
    %214 = vector.shape_cast %210 : vector<8x8xf32> to vector<1x8x8xf32>
    %215 = vector.shape_cast %211 : vector<8x8xf32> to vector<1x8x8xf32>
    %216 = vector.shape_cast %212 : vector<8x8xf32> to vector<1x8x8xf32>
    %217 = vector.shape_cast %213 : vector<8x8xf32> to vector<1x8x8xf32>
    %218 = tpu.concatenate %214, %215, %216, %217 in 0 : vector<1x8x8xf32>, vector<1x8x8xf32>, vector<1x8x8xf32>, vector<1x8x8xf32> -> vector<4x8x8xf32>
    %219 = vector.extract_strided_slice %200 {offsets = [0, 0], sizes = [4, 8], strides = [1, 1]} : vector<4x32xf32> to vector<4x8xf32>
    %220 = vector.extract_strided_slice %200 {offsets = [0, 8], sizes = [4, 8], strides = [1, 1]} : vector<4x32xf32> to vector<4x8xf32>
    %221 = vector.extract_strided_slice %200 {offsets = [0, 16], sizes = [4, 8], strides = [1, 1]} : vector<4x32xf32> to vector<4x8xf32>
    %222 = vector.extract_strided_slice %200 {offsets = [0, 24], sizes = [4, 8], strides = [1, 1]} : vector<4x32xf32> to vector<4x8xf32>
    %223 = vector.shape_cast %219 : vector<4x8xf32> to vector<1x4x8xf32>
    %224 = vector.shape_cast %220 : vector<4x8xf32> to vector<1x4x8xf32>
    %225 = vector.shape_cast %221 : vector<4x8xf32> to vector<1x4x8xf32>
    %226 = vector.shape_cast %222 : vector<4x8xf32> to vector<1x4x8xf32>
    %227 = tpu.concatenate %223, %224, %225, %226 in 0 : vector<1x4x8xf32>, vector<1x4x8xf32>, vector<1x4x8xf32>, vector<1x4x8xf32> -> vector<4x4x8xf32>
    %228 = vector.extract_strided_slice %209 {offsets = [0, 0], sizes = [4, 8], strides = [1, 1]} : vector<4x32xf32> to vector<4x8xf32>
    %229 = vector.extract_strided_slice %209 {offsets = [0, 8], sizes = [4, 8], strides = [1, 1]} : vector<4x32xf32> to vector<4x8xf32>
    %230 = vector.extract_strided_slice %209 {offsets = [0, 16], sizes = [4, 8], strides = [1, 1]} : vector<4x32xf32> to vector<4x8xf32>
    %231 = vector.extract_strided_slice %209 {offsets = [0, 24], sizes = [4, 8], strides = [1, 1]} : vector<4x32xf32> to vector<4x8xf32>
    %232 = vector.shape_cast %228 : vector<4x8xf32> to vector<1x4x8xf32>
    %233 = vector.shape_cast %229 : vector<4x8xf32> to vector<1x4x8xf32>
    %234 = vector.shape_cast %230 : vector<4x8xf32> to vector<1x4x8xf32>
    %235 = vector.shape_cast %231 : vector<4x8xf32> to vector<1x4x8xf32>
    %236 = tpu.concatenate %232, %233, %234, %235 in 0 : vector<1x4x8xf32>, vector<1x4x8xf32>, vector<1x4x8xf32>, vector<1x4x8xf32> -> vector<4x4x8xf32>
    %cst_115 = arith.constant dense<0.000000e+00> : vector<4x8x4xf32>
    %237 = tpu.matmul %218, %227, %cst_115 {dimension_numbers = #tpu.dot_dimension_numbers<[2], [2], [1], [1], [0, 0, 0, 1, 1, 1], [0], [0]>} : vector<4x8x8xf32>, vector<4x4x8xf32>, vector<4x8x4xf32> -> vector<4x8x4xf32>
    %238 = math.exp %237 : vector<4x8x4xf32>
    %cst_116 = arith.constant dense<0.000000e+00> : vector<4x8xf32>
    %239 = vector.multi_reduction <add>, %238, %cst_116 [2] : vector<4x8x4xf32> to vector<4x8xf32>
    %240 = vector.shape_cast %239 : vector<4x8xf32> to vector<4x8x1xf32>
    %241 = tpu.reciprocal %240 {approx = true} : vector<4x8x1xf32> -> vector<4x8x1xf32>
    %242 = vector.broadcast %241 : vector<4x8x1xf32> to vector<4x8x4xf32>
    %243 = arith.mulf %238, %242 : vector<4x8x4xf32>
    %cst_117 = arith.constant dense<0.000000e+00> : vector<4x8x8xf32>
    %244 = tpu.matmul %243, %236, %cst_117 {dimension_numbers = #tpu.dot_dimension_numbers<[2], [1], [1], [2], [0, 0, 0, 1, 1, 2], [0], [0]>} : vector<4x8x4xf32>, vector<4x4x8xf32>, vector<4x8x8xf32> -> vector<4x8x8xf32>
    %245 = vector.extract_strided_slice %244 {offsets = [0, 0, 0], sizes = [1, 8, 8], strides = [1, 1, 1]} : vector<4x8x8xf32> to vector<1x8x8xf32>
    %246 = vector.shape_cast %245 : vector<1x8x8xf32> to vector<8x8xf32>
    %247 = vector.extract_strided_slice %244 {offsets = [1, 0, 0], sizes = [1, 8, 8], strides = [1, 1, 1]} : vector<4x8x8xf32> to vector<1x8x8xf32>
    %248 = vector.shape_cast %247 : vector<1x8x8xf32> to vector<8x8xf32>
    %249 = vector.extract_strided_slice %244 {offsets = [2, 0, 0], sizes = [1, 8, 8], strides = [1, 1, 1]} : vector<4x8x8xf32> to vector<1x8x8xf32>
    %250 = vector.shape_cast %249 : vector<1x8x8xf32> to vector<8x8xf32>
    %251 = vector.extract_strided_slice %244 {offsets = [3, 0, 0], sizes = [1, 8, 8], strides = [1, 1, 1]} : vector<4x8x8xf32> to vector<1x8x8xf32>
    %252 = vector.shape_cast %251 : vector<1x8x8xf32> to vector<8x8xf32>
    %253 = tpu.concatenate %246, %248, %250, %252 in 1 : vector<8x8xf32>, vector<8x8xf32>, vector<8x8xf32>, vector<8x8xf32> -> vector<8x32xf32>
    %c1_118 = arith.constant 1 : index
    %c0_119 = arith.constant 0 : index
    %c0_120 = arith.constant 0 : index
    %254 = vector.load %arg8[%c1_118, %c0_119, %c0_120] : memref<2x32x64xf32, #tpu.memory_space<vmem>>, vector<1x32x64xf32>
    %255 = vector.shape_cast %254 : vector<1x32x64xf32> to vector<32x64xf32>
    %cst_121 = arith.constant dense<0.000000e+00> : vector<8x64xf32>
    %256 = tpu.matmul %253, %255, %cst_121 {dimension_numbers = #tpu.dot_dimension_numbers<[1], [0], [0], [1], [0, 0, 1, 1], [], []>} : vector<8x32xf32>, vector<32x64xf32>, vector<8x64xf32> -> vector<8x64xf32>
    %c1_122 = arith.constant 1 : index
    %c0_123 = arith.constant 0 : index
    %c0_124 = arith.constant 0 : index
    %257 = vector.load %arg9[%c1_122, %c0_123, %c0_124] : memref<2x8x16xf32, #tpu.memory_space<vmem>>, vector<1x8x16xf32>
    %258 = vector.shape_cast %257 : vector<1x8x16xf32> to vector<8x16xf32>
    %259 = vector.extract_strided_slice %256 {offsets = [0, 0], sizes = [8, 32], strides = [1, 1]} : vector<8x64xf32> to vector<8x32xf32>
    %260 = vector.extract_strided_slice %256 {offsets = [0, 32], sizes = [8, 32], strides = [1, 1]} : vector<8x64xf32> to vector<8x32xf32>
    %261 = tpu.concatenate %259, %260 in 0 : vector<8x32xf32>, vector<8x32xf32> -> vector<16x32xf32>
    %cst_125 = arith.constant dense<0.000000e+00> : vector<8x32xf32>
    %262 = tpu.matmul %258, %261, %cst_125 {dimension_numbers = #tpu.dot_dimension_numbers<[1], [0], [0], [1], [0, 0, 1, 1], [], []>} : vector<8x16xf32>, vector<16x32xf32>, vector<8x32xf32> -> vector<8x32xf32>
    %263 = arith.addf %170, %262 : vector<8x32xf32>
    %c4_126 = arith.constant 4 : index
    %c0_127 = arith.constant 0 : index
    %c0_128 = arith.constant 0 : index
    %264 = vector.load %arg14[%c4_126, %c0_127, %c0_128] : memref<8x1x32xf32, #tpu.memory_space<vmem>>, vector<1x1x32xf32>
    %265 = vector.shape_cast %264 : vector<1x1x32xf32> to vector<1x32xf32>
    %c5_129 = arith.constant 5 : index
    %c0_130 = arith.constant 0 : index
    %c0_131 = arith.constant 0 : index
    %266 = vector.load %arg14[%c5_129, %c0_130, %c0_131] : memref<8x1x32xf32, #tpu.memory_space<vmem>>, vector<1x1x32xf32>
    %267 = vector.shape_cast %266 : vector<1x1x32xf32> to vector<1x32xf32>
    %cst_132 = arith.constant dense<0.000000e+00> : vector<8xf32>
    %268 = vector.multi_reduction <add>, %263, %cst_132 [1] : vector<8x32xf32> to vector<8xf32>
    %269 = vector.shape_cast %268 : vector<8xf32> to vector<8x1xf32>
    %cst_133 = arith.constant 3.200000e+01 : f32
    %270 = vector.broadcast %cst_133 : f32 to vector<8x1xf32>
    %271 = arith.divf %269, %270 : vector<8x1xf32>
    %272 = vector.broadcast %271 : vector<8x1xf32> to vector<8x32xf32>
    %273 = arith.subf %263, %272 : vector<8x32xf32>
    %274 = arith.mulf %273, %273 : vector<8x32xf32>
    %cst_134 = arith.constant dense<0.000000e+00> : vector<8xf32>
    %275 = vector.multi_reduction <add>, %274, %cst_134 [1] : vector<8x32xf32> to vector<8xf32>
    %276 = vector.shape_cast %275 : vector<8xf32> to vector<8x1xf32>
    %cst_135 = arith.constant 3.200000e+01 : f32
    %277 = vector.broadcast %cst_135 : f32 to vector<8x1xf32>
    %278 = arith.divf %276, %277 : vector<8x1xf32>
    %cst_136 = arith.constant 9.99999974E-6 : f32
    %279 = vector.broadcast %cst_136 : f32 to vector<8x1xf32>
    %280 = arith.addf %278, %279 : vector<8x1xf32>
    %281 = math.rsqrt %280 : vector<8x1xf32>
    %282 = vector.broadcast %281 : vector<8x1xf32> to vector<8x32xf32>
    %283 = arith.mulf %273, %282 : vector<8x32xf32>
    %284 = vector.broadcast %265 : vector<1x32xf32> to vector<8x32xf32>
    %285 = arith.mulf %283, %284 : vector<8x32xf32>
    %286 = vector.broadcast %267 : vector<1x32xf32> to vector<8x32xf32>
    %287 = arith.addf %285, %286 : vector<8x32xf32>
    %c1_137 = arith.constant 1 : index
    %c0_138 = arith.constant 0 : index
    %c0_139 = arith.constant 0 : index
    %288 = vector.load %arg10[%c1_137, %c0_138, %c0_139] : memref<2x32x128xf32, #tpu.memory_space<vmem>>, vector<1x32x128xf32>
    %289 = vector.shape_cast %288 : vector<1x32x128xf32> to vector<32x128xf32>
    %cst_140 = arith.constant dense<0.000000e+00> : vector<8x128xf32>
    %290 = tpu.matmul %287, %289, %cst_140 {dimension_numbers = #tpu.dot_dimension_numbers<[1], [0], [0], [1], [0, 0, 1, 1], [], []>} : vector<8x32xf32>, vector<32x128xf32>, vector<8x128xf32> -> vector<8x128xf32>
    %c1_141 = arith.constant 1 : index
    %c0_142 = arith.constant 0 : index
    %c0_143 = arith.constant 0 : index
    %291 = vector.load %arg11[%c1_141, %c0_142, %c0_143] : memref<2x8x16xf32, #tpu.memory_space<vmem>>, vector<1x8x16xf32>
    %292 = vector.shape_cast %291 : vector<1x8x16xf32> to vector<8x16xf32>
    %293 = vector.extract_strided_slice %290 {offsets = [0, 0], sizes = [8, 64], strides = [1, 1]} : vector<8x128xf32> to vector<8x64xf32>
    %294 = vector.extract_strided_slice %290 {offsets = [0, 64], sizes = [8, 64], strides = [1, 1]} : vector<8x128xf32> to vector<8x64xf32>
    %295 = tpu.concatenate %293, %294 in 0 : vector<8x64xf32>, vector<8x64xf32> -> vector<16x64xf32>
    %cst_144 = arith.constant dense<0.000000e+00> : vector<8x64xf32>
    %296 = tpu.matmul %292, %295, %cst_144 {dimension_numbers = #tpu.dot_dimension_numbers<[1], [0], [0], [1], [0, 0, 1, 1], [], []>} : vector<8x16xf32>, vector<16x64xf32>, vector<8x64xf32> -> vector<8x64xf32>
    %cst_145 = arith.constant 0.000000e+00 : f32
    %297 = vector.broadcast %cst_145 : f32 to vector<8x64xf32>
    %298 = arith.maximumf %296, %297 : vector<8x64xf32>
    %c1_146 = arith.constant 1 : index
    %c0_147 = arith.constant 0 : index
    %c0_148 = arith.constant 0 : index
    %299 = vector.load %arg12[%c1_146, %c0_147, %c0_148] : memref<2x64x64xf32, #tpu.memory_space<vmem>>, vector<1x64x64xf32>
    %300 = vector.shape_cast %299 : vector<1x64x64xf32> to vector<64x64xf32>
    %cst_149 = arith.constant dense<0.000000e+00> : vector<8x64xf32>
    %301 = tpu.matmul %298, %300, %cst_149 {dimension_numbers = #tpu.dot_dimension_numbers<[1], [0], [0], [1], [0, 0, 1, 1], [], []>} : vector<8x64xf32>, vector<64x64xf32>, vector<8x64xf32> -> vector<8x64xf32>
    %c1_150 = arith.constant 1 : index
    %c0_151 = arith.constant 0 : index
    %c0_152 = arith.constant 0 : index
    %302 = vector.load %arg13[%c1_150, %c0_151, %c0_152] : memref<2x8x16xf32, #tpu.memory_space<vmem>>, vector<1x8x16xf32>
    %303 = vector.shape_cast %302 : vector<1x8x16xf32> to vector<8x16xf32>
    %304 = vector.extract_strided_slice %301 {offsets = [0, 0], sizes = [8, 32], strides = [1, 1]} : vector<8x64xf32> to vector<8x32xf32>
    %305 = vector.extract_strided_slice %301 {offsets = [0, 32], sizes = [8, 32], strides = [1, 1]} : vector<8x64xf32> to vector<8x32xf32>
    %306 = tpu.concatenate %304, %305 in 0 : vector<8x32xf32>, vector<8x32xf32> -> vector<16x32xf32>
    %cst_153 = arith.constant dense<0.000000e+00> : vector<8x32xf32>
    %307 = tpu.matmul %303, %306, %cst_153 {dimension_numbers = #tpu.dot_dimension_numbers<[1], [0], [0], [1], [0, 0, 1, 1], [], []>} : vector<8x16xf32>, vector<16x32xf32>, vector<8x32xf32> -> vector<8x32xf32>
    %308 = arith.addf %287, %307 : vector<8x32xf32>
    %c6 = arith.constant 6 : index
    %c0_154 = arith.constant 0 : index
    %c0_155 = arith.constant 0 : index
    %309 = vector.load %arg14[%c6, %c0_154, %c0_155] : memref<8x1x32xf32, #tpu.memory_space<vmem>>, vector<1x1x32xf32>
    %310 = vector.shape_cast %309 : vector<1x1x32xf32> to vector<1x32xf32>
    %c7 = arith.constant 7 : index
    %c0_156 = arith.constant 0 : index
    %c0_157 = arith.constant 0 : index
    %311 = vector.load %arg14[%c7, %c0_156, %c0_157] : memref<8x1x32xf32, #tpu.memory_space<vmem>>, vector<1x1x32xf32>
    %312 = vector.shape_cast %311 : vector<1x1x32xf32> to vector<1x32xf32>
    %cst_158 = arith.constant dense<0.000000e+00> : vector<8xf32>
    %313 = vector.multi_reduction <add>, %308, %cst_158 [1] : vector<8x32xf32> to vector<8xf32>
    %314 = vector.shape_cast %313 : vector<8xf32> to vector<8x1xf32>
    %cst_159 = arith.constant 3.200000e+01 : f32
    %315 = vector.broadcast %cst_159 : f32 to vector<8x1xf32>
    %316 = arith.divf %314, %315 : vector<8x1xf32>
    %317 = vector.broadcast %316 : vector<8x1xf32> to vector<8x32xf32>
    %318 = arith.subf %308, %317 : vector<8x32xf32>
    %319 = arith.mulf %318, %318 : vector<8x32xf32>
    %cst_160 = arith.constant dense<0.000000e+00> : vector<8xf32>
    %320 = vector.multi_reduction <add>, %319, %cst_160 [1] : vector<8x32xf32> to vector<8xf32>
    %321 = vector.shape_cast %320 : vector<8xf32> to vector<8x1xf32>
    %cst_161 = arith.constant 3.200000e+01 : f32
    %322 = vector.broadcast %cst_161 : f32 to vector<8x1xf32>
    %323 = arith.divf %321, %322 : vector<8x1xf32>
    %cst_162 = arith.constant 9.99999974E-6 : f32
    %324 = vector.broadcast %cst_162 : f32 to vector<8x1xf32>
    %325 = arith.addf %323, %324 : vector<8x1xf32>
    %326 = math.rsqrt %325 : vector<8x1xf32>
    %327 = vector.broadcast %326 : vector<8x1xf32> to vector<8x32xf32>
    %328 = arith.mulf %318, %327 : vector<8x32xf32>
    %329 = vector.broadcast %310 : vector<1x32xf32> to vector<8x32xf32>
    %330 = arith.mulf %328, %329 : vector<8x32xf32>
    %331 = vector.broadcast %312 : vector<1x32xf32> to vector<8x32xf32>
    %332 = arith.addf %330, %331 : vector<8x32xf32>
    %c0_163 = arith.constant 0 : index
    %c0_164 = arith.constant 0 : index
    %c0_165 = arith.constant 0 : index
    %333 = vector.load %arg15[%c0_163, %c0_164, %c0_165] : memref<2x1x32xf32, #tpu.memory_space<vmem>>, vector<1x1x32xf32>
    %334 = vector.shape_cast %333 : vector<1x1x32xf32> to vector<1x32xf32>
    %c1_166 = arith.constant 1 : index
    %c0_167 = arith.constant 0 : index
    %c0_168 = arith.constant 0 : index
    %335 = vector.load %arg15[%c1_166, %c0_167, %c0_168] : memref<2x1x32xf32, #tpu.memory_space<vmem>>, vector<1x1x32xf32>
    %336 = vector.shape_cast %335 : vector<1x1x32xf32> to vector<1x32xf32>
    %cst_169 = arith.constant dense<0.000000e+00> : vector<8xf32>
    %337 = vector.multi_reduction <add>, %332, %cst_169 [1] : vector<8x32xf32> to vector<8xf32>
    %338 = vector.shape_cast %337 : vector<8xf32> to vector<8x1xf32>
    %cst_170 = arith.constant 3.200000e+01 : f32
    %339 = vector.broadcast %cst_170 : f32 to vector<8x1xf32>
    %340 = arith.divf %338, %339 : vector<8x1xf32>
    %341 = vector.broadcast %340 : vector<8x1xf32> to vector<8x32xf32>
    %342 = arith.subf %332, %341 : vector<8x32xf32>
    %343 = arith.mulf %342, %342 : vector<8x32xf32>
    %cst_171 = arith.constant dense<0.000000e+00> : vector<8xf32>
    %344 = vector.multi_reduction <add>, %343, %cst_171 [1] : vector<8x32xf32> to vector<8xf32>
    %345 = vector.shape_cast %344 : vector<8xf32> to vector<8x1xf32>
    %cst_172 = arith.constant 3.200000e+01 : f32
    %346 = vector.broadcast %cst_172 : f32 to vector<8x1xf32>
    %347 = arith.divf %345, %346 : vector<8x1xf32>
    %cst_173 = arith.constant 9.99999974E-6 : f32
    %348 = vector.broadcast %cst_173 : f32 to vector<8x1xf32>
    %349 = arith.addf %347, %348 : vector<8x1xf32>
    %350 = math.rsqrt %349 : vector<8x1xf32>
    %351 = vector.broadcast %350 : vector<8x1xf32> to vector<8x32xf32>
    %352 = arith.mulf %342, %351 : vector<8x32xf32>
    %353 = vector.broadcast %334 : vector<1x32xf32> to vector<8x32xf32>
    %354 = arith.mulf %352, %353 : vector<8x32xf32>
    %355 = vector.broadcast %336 : vector<1x32xf32> to vector<8x32xf32>
    %356 = arith.addf %354, %355 : vector<8x32xf32>
    %c0_174 = arith.constant 0 : index
    %c0_175 = arith.constant 0 : index
    %357 = vector.load %arg16[%c0_174, %c0_175] : memref<32x1xf32, #tpu.memory_space<vmem>>, vector<32x1xf32>
    %cst_176 = arith.constant dense<0.000000e+00> : vector<8x1xf32>
    %358 = tpu.matmul %356, %357, %cst_176 {dimension_numbers = #tpu.dot_dimension_numbers<[1], [0], [0], [1], [0, 0, 1, 1], [], []>} : vector<8x32xf32>, vector<32x1xf32>, vector<8x1xf32> -> vector<8x1xf32>
    %c0_177 = arith.constant 0 : index
    %c0_178 = arith.constant 0 : index
    %359 = vector.load %arg17[%c0_177, %c0_178] : memref<1x1xf32, #tpu.memory_space<vmem>>, vector<1x1xf32>
    %360 = vector.broadcast %359 : vector<1x1xf32> to vector<8x1xf32>
    %361 = arith.addf %358, %360 : vector<8x1xf32>
    %c0_179 = arith.constant 0 : index
    %c0_180 = arith.constant 0 : index
    %c0_181 = arith.constant 0 : index
    %362 = vector.load %arg18[%c0_179, %c0_180, %c0_181] : memref<1x8x1xf32, #tpu.memory_space<vmem>>, vector<1x8x1xf32>
    %363 = vector.shape_cast %362 : vector<1x8x1xf32> to vector<8x1xf32>
    %364 = vector.shape_cast %361 : vector<8x1xf32> to vector<1x8x1xf32>
    tpu.vector_store %arg18[%c0_179, %c0_180, %c0_181], %364 {strides = array<i32>} : memref<1x8x1xf32, #tpu.memory_space<vmem>>, vector<1x8x1xf32>,
    return
  }
  func.func @transform_0(%arg0: i32) -> (i32, i32, i32) {
    %c0_i32 = arith.constant 0 : i32
    %c0_i32_0 = arith.constant 0 : i32
    %c0_i32_1 = arith.constant 0 : i32
    return %arg0, %c0_i32, %c0_i32_0 : i32, i32, i32
  }
  func.func @transform_1(%arg0: i32) -> (i32, i32) {
    %c0_i32 = arith.constant 0 : i32
    %c0_i32_0 = arith.constant 0 : i32
    %c0_i32_1 = arith.constant 0 : i32
    return %c0_i32, %c0_i32_0 : i32, i32
  }
  func.func @transform_2(%arg0: i32) -> (i32, i32) {
    %c0_i32 = arith.constant 0 : i32
    %c0_i32_0 = arith.constant 0 : i32
    %c0_i32_1 = arith.constant 0 : i32
    return %c0_i32, %c0_i32_0 : i32, i32
  }
  func.func @transform_3(%arg0: i32) -> (i32, i32, i32) {
    %c0_i32 = arith.constant 0 : i32
    %c0_i32_0 = arith.constant 0 : i32
    %c0_i32_1 = arith.constant 0 : i32
    %c0_i32_2 = arith.constant 0 : i32
    return %c0_i32, %c0_i32_0, %c0_i32_1 : i32, i32, i32
  }
  func.func @transform_4(%arg0: i32) -> (i32, i32, i32) {
    %c0_i32 = arith.constant 0 : i32
    %c0_i32_0 = arith.constant 0 : i32
    %c0_i32_1 = arith.constant 0 : i32
    %c0_i32_2 = arith.constant 0 : i32
    return %c0_i32, %c0_i32_0, %c0_i32_1 : i32, i32, i32
  }
  func.func @transform_5(%arg0: i32) -> (i32, i32, i32) {
    %c0_i32 = arith.constant 0 : i32
    %c0_i32_0 = arith.constant 0 : i32
    %c0_i32_1 = arith.constant 0 : i32
    %c0_i32_2 = arith.constant 0 : i32
    return %c0_i32, %c0_i32_0, %c0_i32_1 : i32, i32, i32
  }
  func.func @transform_6(%arg0: i32) -> (i32, i32, i32) {
    %c0_i32 = arith.constant 0 : i32
    %c0_i32_0 = arith.constant 0 : i32
    %c0_i32_1 = arith.constant 0 : i32
    %c0_i32_2 = arith.constant 0 : i32
    return %c0_i32, %c0_i32_0, %c0_i32_1 : i32, i32, i32
  }
  func.func @transform_7(%arg0: i32) -> (i32, i32, i32) {
    %c0_i32 = arith.constant 0 : i32
    %c0_i32_0 = arith.constant 0 : i32
    %c0_i32_1 = arith.constant 0 : i32
    %c0_i32_2 = arith.constant 0 : i32
    return %c0_i32, %c0_i32_0, %c0_i32_1 : i32, i32, i32
  }
  func.func @transform_8(%arg0: i32) -> (i32, i32, i32) {
    %c0_i32 = arith.constant 0 : i32
    %c0_i32_0 = arith.constant 0 : i32
    %c0_i32_1 = arith.constant 0 : i32
    %c0_i32_2 = arith.constant 0 : i32
    return %c0_i32, %c0_i32_0, %c0_i32_1 : i32, i32, i32
  }
  func.func @transform_9(%arg0: i32) -> (i32, i32, i32) {
    %c0_i32 = arith.constant 0 : i32
    %c0_i32_0 = arith.constant 0 : i32
    %c0_i32_1 = arith.constant 0 : i32
    %c0_i32_2 = arith.constant 0 : i32
    return %c0_i32, %c0_i32_0, %c0_i32_1 : i32, i32, i32
  }
  func.func @transform_10(%arg0: i32) -> (i32, i32, i32) {
    %c0_i32 = arith.constant 0 : i32
    %c0_i32_0 = arith.constant 0 : i32
    %c0_i32_1 = arith.constant 0 : i32
    %c0_i32_2 = arith.constant 0 : i32
    return %c0_i32, %c0_i32_0, %c0_i32_1 : i32, i32, i32
  }
  func.func @transform_11(%arg0: i32) -> (i32, i32, i32) {
    %c0_i32 = arith.constant 0 : i32
    %c0_i32_0 = arith.constant 0 : i32
    %c0_i32_1 = arith.constant 0 : i32
    %c0_i32_2 = arith.constant 0 : i32
    return %c0_i32, %c0_i32_0, %c0_i32_1 : i32, i32, i32
  }
  func.func @transform_12(%arg0: i32) -> (i32, i32, i32) {
    %c0_i32 = arith.constant 0 : i32
    %c0_i32_0 = arith.constant 0 : i32
    %c0_i32_1 = arith.constant 0 : i32
    %c0_i32_2 = arith.constant 0 : i32
    return %c0_i32, %c0_i32_0, %c0_i32_1 : i32, i32, i32
  }
  func.func @transform_13(%arg0: i32) -> (i32, i32, i32) {
    %c0_i32 = arith.constant 0 : i32
    %c0_i32_0 = arith.constant 0 : i32
    %c0_i32_1 = arith.constant 0 : i32
    %c0_i32_2 = arith.constant 0 : i32
    return %c0_i32, %c0_i32_0, %c0_i32_1 : i32, i32, i32
  }
  func.func @transform_14(%arg0: i32) -> (i32, i32, i32) {
    %c0_i32 = arith.constant 0 : i32
    %c0_i32_0 = arith.constant 0 : i32
    %c0_i32_1 = arith.constant 0 : i32
    %c0_i32_2 = arith.constant 0 : i32
    return %c0_i32, %c0_i32_0, %c0_i32_1 : i32, i32, i32
  }
  func.func @transform_15(%arg0: i32) -> (i32, i32) {
    %c0_i32 = arith.constant 0 : i32
    %c0_i32_0 = arith.constant 0 : i32
    %c0_i32_1 = arith.constant 0 : i32
    return %c0_i32, %c0_i32_0 : i32, i32
  }
  func.func @transform_16(%arg0: i32) -> (i32, i32) {
    %c0_i32 = arith.constant 0 : i32
    %c0_i32_0 = arith.constant 0 : i32
    %c0_i32_1 = arith.constant 0 : i32
    return %c0_i32, %c0_i32_0 : i32, i32
  }
  func.func @transform_17(%arg0: i32) -> (i32, i32, i32) {
    %c0_i32 = arith.constant 0 : i32
    %c0_i32_0 = arith.constant 0 : i32
    %c0_i32_1 = arith.constant 0 : i32
    return %arg0, %c0_i32, %c0_i32_0 : i32, i32, i32
  }
}

</mosaic_0001>

<bundles_post_ra>
// kernel: tpu_custom_call.1
= control target key start
LH: loop header
LB: loop body
LE: loop exit
PB: predicated region body
PF: predicated region fallthrough
CT: control target
= control target key end

     0   :  { %s6985_s0 = inlined_call_operand.hbm [shape: f32[2,8,8], index: 0, kind: input, shape index: {}]   ;;  %s6986_s1 = inlined_call_operand.hbm [shape: f32[24,32], index: 1, kind: input, shape index: {}]   ;;  %s6987_s2 = inlined_call_operand.hbm [shape: f32[8,32], index: 2, kind: input, shape index: {}]   ;;  %s6988_s3 = inlined_call_operand.hbm [shape: f32[2,32,192], index: 3, kind: input, shape index: {}]   ;;  %s6989_s4 = inlined_call_operand.hbm [shape: f32[6,8,16], index: 4, kind: input, shape index: {}]   ;;  %s6990_s5 = inlined_call_operand.hbm [shape: f32[4,32,64], index: 5, kind: input, shape index: {}]   ;;  %s6991_s6 = inlined_call_operand.hbm [shape: f32[4,4,16], index: 6, kind: input, shape index: {}]   ;;  %s6992_s7 = inlined_call_operand.hbm [shape: f32[2,32,64], index: 7, kind: input, shape index: {}]   ;;  %s6993_s8 = inlined_call_operand.hbm [shape: f32[2,8,16], index: 8, kind: input, shape index: {}]   ;;  %s6994_s9 = inlined_call_operand.vmem [shape: f32[2,32,128], index: 9, kind: input, shape index: {}]   ;;  %s6995_s10 = inlined_call_operand.hbm [shape: f32[2,8,16], index: 10, kind: input, shape index: {}]   ;;  %s6996_s11 = inlined_call_operand.hbm [shape: f32[2,64,64], index: 11, kind: input, shape index: {}]   ;;  %s6997_s12 = inlined_call_operand.vmem [shape: f32[2,8,16], index: 12, kind: input, shape index: {}]   ;;  %s6998_s13 = inlined_call_operand.hbm [shape: f32[8,1,32], index: 13, kind: input, shape index: {}]   ;;  %s6999_s14 = inlined_call_operand.vmem [shape: f32[2,1,32], index: 14, kind: input, shape index: {}]   ;;  %s7000_s15 = inlined_call_operand.vmem [shape: f32[32,1], index: 15, kind: input, shape index: {}]   ;;  %s7001_s16 = inlined_call_operand.<no memory space> [shape: f32[1,1], index: 16, kind: input, shape index: {}]   ;;  %s7002_s17 = inlined_call_operand.vmem [shape: f32[2,8,1], index: 17, kind: output, shape index: {}]  }
   0x1   :  { %7022 = sst [smem:[#allocation31_spill]] %s6985_s0  ;;  %v22_v0 = vstv %s7001_s16 }
   0x2   :  { %7023 = sst [smem:[#allocation32_spill]] %s6986_s1  ;;  %23 = vst [vmem:[#allocation2] sm:$0x1] %v22_v0 }
   0x3   :  { %7024 = sst [smem:[#allocation33_spill]] %s6988_s3 }
   0x4   :  { %7025 = sst [smem:[#allocation34_spill]] %s6994_s9 }
   0x5   :  { %7026 = sst [smem:[#allocation35_spill]] %s6997_s12 }
   0x6   :  { %7027 = sst [smem:[#allocation36_spill]] %s6999_s14 }
   0x7   :  { %7028 = sst [smem:[#allocation37_spill]] %s7000_s15 }
   0x8   :  { %7029 = sst [smem:[#allocation38_spill]] %s7002_s17 }
   0x9   :  { %24 = vsyncpa [#allocation4], 0 }
   0xa   :  { %26 = vsyncpa [#allocation4 + $0x1], 0 }
   0xb   :  { %27 = vsyncpa [#allocation6], 0 }
   0xc   :  { %28 = vsyncpa [#allocation9], 0 }
   0xd   :  { %29 = vsyncpa [#allocation12], 0 }
   0xe   :  { %30 = vsyncpa [#allocation15], 0 }
   0xf   :  { %31 = vsyncpa [#allocation18], 0 }
  0x10   :  { %32 = vsyncpa [#allocation21], 0  ;;  %s6251_s26 = smov 0   ;;  %s6253_s27 = smov 0  }
  0x11   :  { %s6255_s28 = smov 0   ;;  %s6257_s29 = smov 0  }
  0x12 LB: > { %s6128_s16 = smov [#allocation5]   ;;  %s6272_s30 = sadd.s32 4294967295, %s6126_s29   ;;  %s6126_s29 = sphi %s6257_s29, %s7072_s29   ;;  %s6122_s28 = sphi %s6255_s28, %s7071_s28   ;;  %s6118_s27 = sphi %s6253_s27, %s7070_s27   ;;  %s6114_s26 = sphi %s6251_s26, %s7069_s26  }
  0x13   : > { %s443_s0 = sshll.u32 %s6128_s16, 4  ;;  %7030 = sst [smem:[#allocation29_spill]] %s6272_s30  ;;  %s6277_s0 = int_to_ptr.vmem [resolvable:$true] %s443_s0 }
  0x14   : > { %p4770_p0 = scmp.ge.s32.totalorder %s6126_s29, 1  ;;  %p7014_p1 = scmp.eq.s32.totalorder %s6272_s30, 0 }
  0x15   : > { %p431_p2 = scmp.lt.s32.totalorder %s6126_s29, 3  ;;  %s6129_s19 = smov [#allocation8]  }
  0x16   : > { %s467_s1 = sshll.u32 %s6129_s19, 4  ;;  %s6130_s21 = smov [#allocation11]   ;;  %s6291_s1 = int_to_ptr.vmem [resolvable:$true] %s467_s1 }
  0x17   : > { %p6279_p3 = pnand %p4770_p0, %p431_p2  ;;  %s6293_s22 = sshll.u32 %s6130_s21, 4  ;;  %s494_s22 = int_to_ptr.vmem [resolvable:$true] %s6293_s22 }
  0x18   : > { %s7034_s25 = sld [smem:[#allocation32_spill]] }
  0x19   : > { %s7031_s18 = scalar_select %p6279_p3, 1, 0 }
  0x1a   : > { %p5556_p4 = pneg %p6279_p3 }
  0x1b   : > { %7032 = sst [smem:[#allocation30_spill]] %s7031_s18 }
  0x1c   : > { %p6287_p5 = pnand %p5556_p4, %p7014_p1 }
  0x1e   : > { %s5730_s16 = scalar_lea.hbm %s7034_s25, 384  ;;  %p6303_p7 = pneg %p6287_p5 }
  0x1f   : > { %p5731_p6 = scmp.ne.s32.totalorder %s7034_s25, %s5730_s16  ;;  %p5737_p10 = scmp.lt.u32.totalorder %s5730_s16, %s7034_s25 }
  0x21   : > { %p5733_p8 = pnand %p6303_p7, %p5731_p6 }
  0x23   : > { %p5734_p9 = pneg %p5733_p8 }
  0x25   : > { %p5739_p11 = pnand %p5737_p10, %p5734_p9 }
  0x27   : > { %5742 = shalt.err (!%p5739_p11)
}
  0x28   : > { %s5743_s14 = scalar_lea.vmem %s6277_s0, 384  ;;  %p5751_p2 = scmp.lt.s32.totalorder %s6277_s0, %s6277_s0 }
  0x29   : > { %p5744_p12 = scmp.ne.s32.totalorder %s6277_s0, %s5743_s14  ;;  %p5752_p4 = scmp.lt.s32.totalorder %s5743_s14, %s5743_s14 }
  0x2b   : > { %p5746_p13 = pnand %p5744_p12, %p6303_p7  ;;  %p5753_p6 = por %p5752_p4, %p5751_p2 }
  0x2d   : > { %p5747_p0 = pneg %p5746_p13 }
  0x2f   : > { %p5754_p8 = pnand %p5753_p6, %p5747_p0 }
  0x31   : > { %5757 = shalt.err (!%p5754_p8)
}
  0x32   : > { %s7012_s17 = smov 128   ;;  %s7017_s15 = smov 8  }
  0x33   : > { %5559 = dma.hbm_to_vmem [thread:$0]  (!%p6287_p5), %s7034_s25, 384, %s6277_s0, [#allocation6], %s7012_s17, %s7012_s17, %s7017_s15  }
  0x34   : > { %s7036_s3 = sld [smem:[#allocation33_spill]] }
  0x3a   : > { %s5758_s14 = scalar_lea.hbm %s7036_s3, 2048 }
  0x3b   : > { %p5759_p9 = scmp.ne.s32.totalorder %s7036_s3, %s5758_s14  ;;  %p5765_p12 = scmp.lt.u32.totalorder %s5758_s14, %s7036_s3 }
  0x3d   : > { %p5761_p10 = pnand %p5759_p9, %p6303_p7 }
  0x3f   : > { %p5762_p11 = pneg %p5761_p10 }
  0x41   : > { %p5767_p13 = pnand %p5765_p12, %p5762_p11 }
  0x43   : > { %5770 = shalt.err (!%p5767_p13)
}
  0x44   : > { %s5771_s0 = scalar_lea.vmem %s6291_s1, 2048  ;;  %p5779_p6 = scmp.lt.s32.totalorder %s6291_s1, %s6291_s1 }
  0x45   : > { %p5772_p0 = scmp.ne.s32.totalorder %s6291_s1, %s5771_s0  ;;  %p5780_p8 = scmp.lt.s32.totalorder %s5771_s0, %s5771_s0 }
  0x47   : > { %p5774_p2 = pnand %p5772_p0, %p6303_p7  ;;  %p5781_p9 = por %p5780_p8, %p5779_p6 }
  0x49   : > { %p5775_p4 = pneg %p5774_p2 }
  0x4b   : > { %p5782_p10 = pnand %p5781_p9, %p5775_p4 }
  0x4d   : > { %5785 = shalt.err (!%p5782_p10)
}
  0x4e   : > { %s6133_s9 = smov 256   ;;  %s7016_s12 = smov 16  }
  0x4f   : > { %5565 = dma.hbm_to_vmem [thread:$0]  (!%p6287_p5), %s7036_s3, 2048, %s6291_s1, [#allocation9], %s6133_s9, %s6133_s9, %s7016_s12  }
  0x50   : > { %s5786_s16 = scalar_lea.hbm %s6990_s5, 2048 }
  0x51   : > { %p5787_p11 = scmp.ne.s32.totalorder %s6990_s5, %s5786_s16  ;;  %p5793_p0 = scmp.lt.u32.totalorder %s5786_s16, %s6990_s5 }
  0x53   : > { %p5789_p12 = pnand %p5787_p11, %p6303_p7 }
  0x55   : > { %p5790_p13 = pneg %p5789_p12 }
  0x57   : > { %p5795_p2 = pnand %p5793_p0, %p5790_p13 }
  0x59   : > { %5798 = shalt.err (!%p5795_p2)
}
  0x5a   : > { %s5799_s30 = scalar_lea.vmem %s494_s22, 2048  ;;  %p5807_p9 = scmp.lt.s32.totalorder %s494_s22, %s494_s22 }
  0x5b   : > { %p5800_p4 = scmp.ne.s32.totalorder %s494_s22, %s5799_s30  ;;  %p5808_p10 = scmp.lt.s32.totalorder %s5799_s30, %s5799_s30 }
  0x5d   : > { %p5802_p6 = pnand %p5800_p4, %p6303_p7  ;;  %p5809_p1 = por %p5808_p10, %p5807_p9 }
  0x5f   : > { %p5803_p8 = pneg %p5802_p6 }
  0x61   : > { %p5810_p3 = pnand %p5809_p1, %p5803_p8 }
  0x63   : > { %5813 = shalt.err (!%p5810_p3)
}
  0x64   : > { %s7037_s1 = smov 128   ;;  %s6135_s18 = smov [#allocation14]  }
  0x65   : > { %5571 = dma.hbm_to_vmem [thread:$0]  (!%p6287_p5), %s6990_s5, 2048, %s494_s22, [#allocation12], %s7037_s1, %s7037_s1, %s7017_s15  }
  0x66   : > { %s519_s23 = sshll.u32 %s6135_s18, 4  ;;  %s6136_s24 = smov [#allocation17]   ;;  %s520_s23 = int_to_ptr.vmem [resolvable:$true] %s519_s23 }
  0x67   : > { %s548_s16 = sshll.u32 %s6136_s24, 4  ;;  %s5814_s0 = scalar_lea.hbm %s6992_s7, 1024  ;;  %s549_s16 = int_to_ptr.vmem [resolvable:$true] %s548_s16 }
  0x68   : > { %p5815_p1 = scmp.ne.s32.totalorder %s6992_s7, %s5814_s0  ;;  %p5821_p12 = scmp.lt.u32.totalorder %s5814_s0, %s6992_s7 }
  0x6a   : > { %p5817_p3 = pnand %p5815_p1, %p6303_p7 }
  0x6c   : > { %p5818_p11 = pneg %p5817_p3 }
  0x6e   : > { %p5823_p13 = pnand %p5821_p12, %p5818_p11 }
  0x70   : > { %5826 = shalt.err (!%p5823_p13)
}
  0x71   : > { %s5827_s22 = scalar_lea.vmem %s520_s23, 1024  ;;  %p5835_p6 = scmp.lt.s32.totalorder %s520_s23, %s520_s23 }
  0x72   : > { %p5828_p0 = scmp.ne.s32.totalorder %s520_s23, %s5827_s22  ;;  %p5836_p8 = scmp.lt.s32.totalorder %s5827_s22, %s5827_s22 }
  0x74   : > { %p5830_p2 = pnand %p5828_p0, %p6303_p7  ;;  %p5837_p9 = por %p5836_p8, %p5835_p6 }
  0x76   : > { %p5831_p4 = pneg %p5830_p2 }
  0x78   : > { %p5838_p10 = pnand %p5837_p9, %p5831_p4 }
  0x7a   : > { %5841 = shalt.err (!%p5838_p10)
}
  0x7b   : > { %5577 = dma.hbm_to_vmem [thread:$0]  (!%p6287_p5), %s6992_s7, 1024, %s520_s23, [#allocation15], %s7037_s1, %s7037_s1, %s7017_s15  }
  0x7c   : > { %s5842_s24 = scalar_lea.hbm %s6995_s10, 256 }
  0x7d   : > { %p5843_p1 = scmp.ne.s32.totalorder %s6995_s10, %s5842_s24  ;;  %p5849_p12 = scmp.lt.u32.totalorder %s5842_s24, %s6995_s10 }
  0x7f   : > { %p5845_p3 = pnand %p5843_p1, %p6303_p7 }
  0x81   : > { %p5846_p11 = pneg %p5845_p3 }
  0x83   : > { %p5851_p13 = pnand %p5849_p12, %p5846_p11 }
  0x85   : > { %5854 = shalt.err (!%p5851_p13)
}
  0x86   : > { %s5855_s17 = scalar_lea.vmem %s549_s16, 256  ;;  %p5863_p6 = scmp.lt.s32.totalorder %s549_s16, %s549_s16 }
  0x87   : > { %p5856_p0 = scmp.ne.s32.totalorder %s549_s16, %s5855_s17  ;;  %p5864_p8 = scmp.lt.s32.totalorder %s5855_s17, %s5855_s17 }
  0x89   : > { %p5858_p2 = pnand %p5856_p0, %p6303_p7  ;;  %p5865_p9 = por %p5864_p8, %p5863_p6 }
  0x8b   : > { %p5859_p4 = pneg %p5858_p2 }
  0x8d   : > { %p5866_p10 = pnand %p5865_p9, %p5859_p4 }
  0x8f   : > { %5869 = shalt.err (!%p5866_p10)
}
  0x90   : > { %5583 = dma.hbm_to_vmem [thread:$0]  (!%p6287_p5), %s6995_s10, 256, %s549_s16, [#allocation18], %s7037_s1, %s7037_s1, %s7017_s15  }
  0x91   : > { %s6137_s3 = smov [#allocation7]   ;;  %s6138_s9 = smov [#allocation10]  }
  0x92   : > { %s457_s12 = sshll.u32 %s6137_s3, 4  ;;  %s480_s18 = sshll.u32 %s6138_s9, 4  ;;  %s458_s12 = int_to_ptr.vmem [resolvable:$true] %s457_s12  ;;  %s481_s18 = int_to_ptr.vmem [resolvable:$true] %s480_s18 }
  0x93   : > { %s5870_s14 = scalar_lea.hbm %s6987_s2, 128 }
  0x94   : > { %p5871_p1 = scmp.ne.s32.totalorder %s6987_s2, %s5870_s14  ;;  %p5877_p12 = scmp.lt.u32.totalorder %s5870_s14, %s6987_s2 }
  0x96   : > { %p5873_p3 = pnand %p5871_p1, %p6303_p7 }
  0x98   : > { %p5874_p11 = pneg %p5873_p3 }
  0x9a   : > { %p5879_p13 = pnand %p5877_p12, %p5874_p11 }
  0x9c   : > { %5882 = shalt.err (!%p5879_p13)
}
  0x9d   : > { %s5883_s16 = scalar_lea.vmem %s458_s12, 128  ;;  %p5891_p6 = scmp.lt.s32.totalorder %s458_s12, %s458_s12 }
  0x9e   : > { %p5884_p0 = scmp.ne.s32.totalorder %s458_s12, %s5883_s16  ;;  %p5892_p8 = scmp.lt.s32.totalorder %s5883_s16, %s5883_s16 }
  0xa0   : > { %p5886_p2 = pnand %p5884_p0, %p6303_p7  ;;  %p5893_p9 = por %p5892_p8, %p5891_p6 }
  0xa2   : > { %p5887_p4 = pneg %p5886_p2 }
  0xa4   : > { %p5894_p10 = pnand %p5893_p9, %p5887_p4 }
  0xa6   : > { %5897 = shalt.err (!%p5894_p10)
}
  0xa7   : > { %5562 = dma.hbm_to_vmem [thread:$0]  (!%p6287_p5), %s6987_s2, 128, %s458_s12, [#allocation6]  }
  0xa8   : > { %s5898_s21 = scalar_lea.hbm %s6989_s4, 768 }
  0xa9   : > { %p5899_p1 = scmp.ne.s32.totalorder %s6989_s4, %s5898_s21  ;;  %p5905_p12 = scmp.lt.u32.totalorder %s5898_s21, %s6989_s4 }
  0xab   : > { %p5901_p3 = pnand %p5899_p1, %p6303_p7 }
  0xad   : > { %p5902_p11 = pneg %p5901_p3 }
  0xaf   : > { %p5907_p13 = pnand %p5905_p12, %p5902_p11 }
  0xb1   : > { %5910 = shalt.err (!%p5907_p13)
}
  0xb2   : > { %s5911_s23 = scalar_lea.vmem %s481_s18, 768  ;;  %p5919_p6 = scmp.lt.s32.totalorder %s481_s18, %s481_s18 }
  0xb3   : > { %p5912_p0 = scmp.ne.s32.totalorder %s481_s18, %s5911_s23  ;;  %p5920_p8 = scmp.lt.s32.totalorder %s5911_s23, %s5911_s23 }
  0xb5   : > { %p5914_p2 = pnand %p5912_p0, %p6303_p7  ;;  %p5921_p9 = por %p5920_p8, %p5919_p6 }
  0xb7   : > { %p5915_p4 = pneg %p5914_p2 }
  0xb9   : > { %p5922_p10 = pnand %p5921_p9, %p5915_p4 }
  0xbb   : > { %5925 = shalt.err (!%p5922_p10)
}
  0xbc   : > { %5568 = dma.hbm_to_vmem [thread:$0]  (!%p6287_p5), %s6989_s4, 768, %s481_s18, [#allocation9], %s7037_s1, %s7037_s1, %s7017_s15  }
  0xbd   : > { %s6139_s22 = smov [#allocation13]   ;;  %s5926_s21 = scalar_lea.hbm %s6991_s6, 256 }
  0xbe   : > { %s506_s3 = sshll.u32 %s6139_s22, 4  ;;  %p5927_p1 = scmp.ne.s32.totalorder %s6991_s6, %s5926_s21  ;;  %s507_s3 = int_to_ptr.vmem [resolvable:$true] %s506_s3 }
  0xbf   : > { %p5933_p12 = scmp.lt.u32.totalorder %s5926_s21, %s6991_s6 }
  0xc0   : > { %p5929_p3 = pnand %p5927_p1, %p6303_p7 }
  0xc2   : > { %p5930_p11 = pneg %p5929_p3 }
  0xc4   : > { %p5935_p13 = pnand %p5933_p12, %p5930_p11 }
  0xc6   : > { %5938 = shalt.err (!%p5935_p13)
}
  0xc7   : > { %s5939_s18 = scalar_lea.vmem %s507_s3, 256  ;;  %p5947_p6 = scmp.lt.s32.totalorder %s507_s3, %s507_s3 }
  0xc8   : > { %p5940_p0 = scmp.ne.s32.totalorder %s507_s3, %s5939_s18  ;;  %p5948_p8 = scmp.lt.s32.totalorder %s5939_s18, %s5939_s18 }
  0xca   : > { %p5942_p2 = pnand %p5940_p0, %p6303_p7  ;;  %p5949_p9 = por %p5948_p8, %p5947_p6 }
  0xcc   : > { %p5943_p4 = pneg %p5942_p2 }
  0xce   : > { %p5950_p10 = pnand %p5949_p9, %p5943_p4 }
  0xd0   : > { %5953 = shalt.err (!%p5950_p10)
}
  0xd1   : > { %s6140_s23 = smov 64   ;;  %s6141_s12 = smov 4  }
  0xd2   : > { %5574 = dma.hbm_to_vmem [thread:$0]  (!%p6287_p5), %s6991_s6, 256, %s507_s3, [#allocation12], %s6140_s23, %s6140_s23, %s6141_s12  }
  0xd3   : > { %s6142_s9 = smov [#allocation16]   ;;  %s6143_s21 = smov [#allocation19]  }
  0xd4   : > { %s532_s24 = sshll.u32 %s6142_s9, 4  ;;  %s561_s14 = sshll.u32 %s6143_s21, 4  ;;  %s533_s24 = int_to_ptr.vmem [resolvable:$true] %s532_s24  ;;  %s6472_s14 = int_to_ptr.vmem [resolvable:$true] %s561_s14 }
  0xd5   : > { %s5954_s17 = scalar_lea.hbm %s6993_s8, 256 }
  0xd6   : > { %p5955_p1 = scmp.ne.s32.totalorder %s6993_s8, %s5954_s17  ;;  %p5961_p12 = scmp.lt.u32.totalorder %s5954_s17, %s6993_s8 }
  0xd8   : > { %p5957_p3 = pnand %p5955_p1, %p6303_p7 }
  0xda   : > { %p5958_p11 = pneg %p5957_p3 }
  0xdc   : > { %p5963_p13 = pnand %p5961_p12, %p5958_p11 }
  0xde   : > { %5966 = shalt.err (!%p5963_p13)
}
  0xdf   : > { %s5967_s23 = scalar_lea.vmem %s533_s24, 256  ;;  %p5975_p6 = scmp.lt.s32.totalorder %s533_s24, %s533_s24 }
  0xe0   : > { %p5968_p0 = scmp.ne.s32.totalorder %s533_s24, %s5967_s23  ;;  %p5976_p8 = scmp.lt.s32.totalorder %s5967_s23, %s5967_s23 }
  0xe2   : > { %p5970_p2 = pnand %p5968_p0, %p6303_p7  ;;  %p5977_p9 = por %p5976_p8, %p5975_p6 }
  0xe4   : > { %p5971_p4 = pneg %p5970_p2 }
  0xe6   : > { %p5978_p10 = pnand %p5977_p9, %p5971_p4 }
  0xe8   : > { %5981 = shalt.err (!%p5978_p10)
}
  0xe9   : > { %s7038_s15 = smov 8   ;;  %s5982_s0 = scalar_lea.hbm %s6996_s11, 2048 }
  0xea   : > { %5580 = dma.hbm_to_vmem [thread:$0]  (!%p6287_p5), %s6993_s8, 256, %s533_s24, [#allocation15], %s7037_s1, %s7037_s1, %s7038_s15  }
  0xeb   : > { %p5983_p1 = scmp.ne.s32.totalorder %s6996_s11, %s5982_s0  ;;  %p5989_p12 = scmp.lt.u32.totalorder %s5982_s0, %s6996_s11 }
  0xed   : > { %p5985_p3 = pnand %p5983_p1, %p6303_p7 }
  0xef   : > { %p5986_p11 = pneg %p5985_p3 }
  0xf1   : > { %p5991_p13 = pnand %p5989_p12, %p5986_p11 }
  0xf3   : > { %5994 = shalt.err (!%p5991_p13)
}
  0xf4   : > { %s5995_s24 = scalar_lea.vmem %s6472_s14, 2048  ;;  %p6003_p6 = scmp.lt.s32.totalorder %s6472_s14, %s6472_s14 }
  0xf5   : > { %p5996_p0 = scmp.ne.s32.totalorder %s6472_s14, %s5995_s24  ;;  %p6004_p8 = scmp.lt.s32.totalorder %s5995_s24, %s5995_s24 }
  0xf7   : > { %p5998_p2 = pnand %p5996_p0, %p6303_p7  ;;  %p6005_p9 = por %p6004_p8, %p6003_p6 }
  0xf9   : > { %p5999_p4 = pneg %p5998_p2 }
  0xfb   : > { %p6006_p10 = pnand %p6005_p9, %p5999_p4 }
  0xfd   : > { %6009 = shalt.err (!%p6006_p10)
}
  0xfe   : > { %5586 = dma.hbm_to_vmem [thread:$0]  (!%p6287_p5), %s6996_s11, 2048, %s6472_s14, [#allocation18], %s7037_s1, %s7037_s1, %s7038_s15  }
  0xff   : > { %s6144_s12 = smov [#allocation20]   ;;  %s6010_s0 = scalar_lea.hbm %s6998_s13, 128 }
 0x100   : > { %s577_s22 = sshll.u32 %s6144_s12, 4  ;;  %p6011_p1 = scmp.ne.s32.totalorder %s6998_s13, %s6010_s0  ;;  %s578_s22 = int_to_ptr.vmem [resolvable:$true] %s577_s22 }
 0x101   : > { %p6017_p12 = scmp.lt.u32.totalorder %s6010_s0, %s6998_s13 }
 0x102   : > { %p6013_p3 = pnand %p6011_p1, %p6303_p7 }
 0x104   : > { %p6014_p11 = pneg %p6013_p3 }
 0x106   : > { %p6019_p13 = pnand %p6017_p12, %p6014_p11 }
 0x108   : > { %6022 = shalt.err (!%p6019_p13)
}
 0x109   : > { %s6023_s1 = scalar_lea.vmem %s578_s22, 128  ;;  %p6031_p6 = scmp.lt.s32.totalorder %s578_s22, %s578_s22 }
 0x10a   : > { %p6024_p0 = scmp.ne.s32.totalorder %s578_s22, %s6023_s1  ;;  %p6032_p8 = scmp.lt.s32.totalorder %s6023_s1, %s6023_s1 }
 0x10c   : > { %p6026_p2 = pnand %p6024_p0, %p6303_p7  ;;  %p6033_p9 = por %p6032_p8, %p6031_p6 }
 0x10e   : > { %p6027_p4 = pneg %p6026_p2 }
 0x110   : > { %p6034_p10 = pnand %p6033_p9, %p6027_p4 }
 0x112   : > { %6037 = shalt.err (!%p6034_p10)
}
 0x113   : > { %s6145_s14 = smov 1   ;;  %s7039_s15 = smov 16  }
 0x114   : > { %s7040_s19 = sld [smem:[#allocation29_spill]]  ;;  %s6542_s20 = sadd.s32 1, %s6126_s29  }
 0x115   : > { %5589 = dma.hbm_to_vmem [thread:$0]  (!%p6287_p5), %s6998_s13, 128, %s578_s22, [#allocation21], %s7039_s15, %s7039_s15, %s6145_s14  }
 0x116   : > { %s45_s23 = sadd.s32 1, %s6122_s28  ;;  %s42_s12 = ssub.s32 %s6126_s29, %s6542_s20 }
 0x117   : > { %p52_p7 = scmp.ne.s32.totalorder %s6122_s28, %s6118_s27  ;;  %p43_p1 = scmp.eq.s32.totalorder %s42_s12, 0 }
 0x118   : > { %p53_p3 = scmp.eq.s32.totalorder %s6126_s29, 0  ;;  %p58_p11 = scmp.ne.s32.totalorder %s6118_s27, %s6114_s26 }
 0x119   : > { %p5605_p12 = scmp.lt.s32.totalorder %s6126_s29, 2  ;;  %s600_s0 = sand.u32 1, %s6122_s28  }
 0x11a   : > { %s6554_s9 = scalar_select %p43_p1, %s6122_s28, %s45_s23  }
 0x11b   : > { %p54_p13 = por %p53_p3, %p52_p7  ;;  %p7041_p0 = scmp.eq.s32.totalorder %s7040_s19, 0 }
 0x11c   : > { %s4784_s22 = sshll.u32 %s6126_s29, 7  ;;  %s4783_s30 = sshll.u32 %s600_s0, 3 }
 0x11d   : > { %p6558_p2 = por %p7041_p0, %p58_p11  ;;  %s7043_s16 = sld [smem:[#allocation31_spill]] }
 0x11e   : > { %s604_s26 = scalar_lea.vmem [#allocation3], %s4783_s30  ;;  %p6569_p5 = pnand %p5605_p12, %p54_p13 }
 0x11f   : > { %s611_s14 = sshll.u32 %s604_s26, 4  ;;  %s601_s29 = scalar_lea.sflag [#allocation4], %s600_s0  ;;  %s6573_s14 = int_to_ptr.vmem [resolvable:$true] %s611_s14 }
 0x120   : > { %p6040_p6 = pneg %p6569_p5 }
 0x123   : > { %s6567_s1 = scalar_lea.hbm %s7043_s16, %s4784_s22  ;;  %s6043_s23 = scalar_lea.hbm %s7043_s16, 256 }
 0x124   : > { %s6038_s24 = scalar_lea.hbm %s6567_s1, 128  ;;  %p6044_p10 = scmp.lt.u32.totalorder %s6567_s1, %s7043_s16 }
 0x125   : > { %p6039_p4 = scmp.ne.s32.totalorder %s6567_s1, %s6038_s24  ;;  %p6045_p7 = scmp.lt.u32.totalorder %s6043_s23, %s6038_s24 }
 0x126   : > { %p6047_p3 = scmp.lt.u32.totalorder %s6038_s24, %s6567_s1 }
 0x127   : > { %p6041_p8 = pnand %p6040_p6, %p6039_p4  ;;  %p6046_p1 = por %p6045_p7, %p6044_p10 }
 0x129   : > { %p6042_p9 = pneg %p6041_p8  ;;  %p6048_p11 = por %p6047_p3, %p6046_p1 }
 0x12b   : > { %p6049_p12 = pnand %p6048_p11, %p6042_p9 }
 0x12d   : > { %6052 = shalt.err (!%p6049_p12)
}
 0x12e   : > { %s6053_s0 = scalar_lea.vmem %s6573_s14, 128  ;;  %s6146_s30 = smov [#allocation3]  }
 0x12f   : > { %p6054_p13 = scmp.ne.s32.totalorder %s6573_s14, %s6053_s0  ;;  %s6058_s17 = sshll.u32 %s6146_s30, 4  ;;  %s6059_s17 = int_to_ptr.vmem [resolvable:$false] %s6058_s17 }
 0x130   : > { %s6060_s18 = scalar_lea.vmem %s6059_s17, 256  ;;  %p6061_p8 = scmp.lt.s32.totalorder %s6573_s14, %s6059_s17 }
 0x131   : > { %p6056_p0 = pnand %p6054_p13, %p6040_p6  ;;  %p6062_p10 = scmp.lt.s32.totalorder %s6060_s18, %s6053_s0 }
 0x133   : > { %p6057_p4 = pneg %p6056_p0  ;;  %p6063_p7 = por %p6062_p10, %p6061_p8 }
 0x135   : > { %p6064_p1 = pnand %p6063_p7, %p6057_p4 }
 0x137   : > { %6067 = shalt.err (!%p6064_p1)
}
 0x138   : > { %5593 = dma.hbm_to_vmem [thread:$0]  (!%p6569_p5), %s6567_s1, 128, %s6573_s14, %s601_s29  }
 0x139   : > { %s7045_s26 = sld [smem:[#allocation30_spill]] }
 0x13f   : > { %p7046_p9 = scmp.ne.s32.totalorder %s7045_s26, 0 }
 0x140   : > { %s622_s24 = sand.u32 (!%p7046_p9), 1, %s6118_s27  }
 0x141   : > { %620 = sbr.rel (%p7046_p9) target bundleno = 9867 (0x268b), region = 88  ;;  %s4786_s3 = sshll.u32 (!%p7046_p9), %s622_s24, 3 }
 0x142   : > { %s623_s19 = scalar_lea.sflag (!%p7046_p9), [#allocation4], %s622_s24  ;;  %s626_s23 = scalar_lea.vmem (!%p7046_p9), [#allocation3], %s4786_s3 }
 0x148   : > { %6085 = dma.done.wait (%p6558_p2), %s623_s19, 128  }
 0x149   : > { %6087 = vsyncadd (%p6558_p2), %s623_s19, 4294967168  ;;  %s7047_s12 = sld [smem:[#allocation29_spill]] }
 0x14f   : > { %p7048_p6 = scmp.eq.s32.totalorder %s7047_s12, 0 }
 0x151   : > { %6089 = dma.done.wait (%p7048_p6), [#allocation6], 512   ;;  %p7049_p3 = pmov %p7048_p6 }
 0x153   : > { %6091 = vsyncadd (%p7049_p3), [#allocation6], 4294966784  ;;  %p7050_p5 = pmov %p7049_p3 }
 0x154   : > { %p7051_p11 = pmov %p7049_p3 }
 0x155   : > { %6093 = dma.done.wait (%p7050_p5), [#allocation9], 2816  }
 0x156   : > { %6095 = vsyncadd (%p7051_p11), [#allocation9], 4294964480  ;;  %p7052_p12 = pmov %p7049_p3 }
 0x157   : > { %p7053_p13 = pmov %p7049_p3 }
 0x158   : > { %6097 = dma.done.wait (%p7052_p12), [#allocation12], 2304  }
 0x159   : > { %6099 = vsyncadd (%p7053_p13), [#allocation12], 4294964992  ;;  %p7054_p2 = pmov %p7049_p3 }
 0x15b   : > { %6101 = dma.done.wait (%p7054_p2), [#allocation15], 1280   ;;  %p7055_p0 = pmov %p7054_p2 }
 0x15d   : > { %6103 = vsyncadd (%p7055_p0), [#allocation15], 4294966016  ;;  %p7056_p4 = pmov %p7055_p0 }
 0x15e   : > { %p7057_p8 = pmov %p7055_p0 }
 0x15f   : > { %6105 = dma.done.wait (%p7056_p4), [#allocation18], 2304  }
 0x160   : > { %6107 = vsyncadd (%p7057_p8), [#allocation18], 4294964992  ;;  %p7058_p10 = pmov %p7055_p0 }
 0x161   : > { %p7059_p7 = pmov %p7055_p0 }
 0x162   : > { %6109 = dma.done.wait (%p7058_p10), [#allocation21], 128  }
 0x163   : > { %6111 = vsyncadd (%p7059_p7), [#allocation21], 4294967168  ;;  %v6147_v1 = vmov 0.0|0.0   ;;  %vm6148_vm0 = vmmov 0   ;;  %v6149_v2 = vmov 0.0   ;;  %v724_v3 = vld [vmem:[%s626_s23] sm:$0xff] }
 0x164   : > { %5365 = vmatprep.subr.bf16.mxu0 %v6147_v1  ;;  %5033 = vmatprep.mubr.msk.f32.mxu0 %vm6148_vm0, %v6149_v2  ;;  %v739_v4 = vld [vmem:[#allocation5] sm:$0xff]  ;;  %v740_v5 = vld [vmem:[#allocation5 + $0x8] sm:$0xff]  ;;  %s7021_s21 = smov 8   ;;  %v726_v6 = vrot.slane %v724_v3, 1  ;;  %v820_v9 = vld [vmem:[#allocation8 + $0x18] sm:$0xff]  ;;  %s7019_s1 = smov 16  }
 0x165   : > { %893 = vmatprep.mubr.f32.mxu1 %v6149_v2  ;;  %728 = vrot.lane.b32.xlu0 %v724_v3, %s7021_s21  ;;  %v5366_v7 = vpack.c.bf16 %v740_v5, %v739_v4  ;;  %v818_v8 = vld [vmem:[#allocation8 + $0x8] sm:$0xff]  ;;  %v817_v11 = vld [vmem:[#allocation8] sm:$0xff]  ;;  %v819_v12 = vld [vmem:[#allocation8 + $0x10] sm:$0xff]  ;;  %v725_v18 = vrot.slane %v724_v3, 7  ;;  %vm735_vm1 = vcmask 64512   ;;  %vm737_vm2 = vcmask 130048  }
 0x166   : > { %v5368_v10 = vpack.c.bf16 %v820_v9, %v818_v8  ;;  %v822_v13 = vld [vmem:[#allocation8 + $0x28] sm:$0xff]  ;;  %v5370_v14 = vpack.c.bf16 %v819_v12, %v817_v11  ;;  %v824_v15 = vld [vmem:[#allocation8 + $0x38] sm:$0xff]  ;;  %v741_v16 = vld [vmem:[#allocation5 + $0x10] sm:$0xff]  ;;  %vm743_vm3 = vcmask 195584   ;;  %vm825_vm4 = vcmask 261120   ;;  %s6152_s14 = smov 96  }
 0x167   : > { %5367 = vmatpush3.bf16.msra.mxu0 %v5366_v7  ;;  %v5372_v17 = vpack.c.bf16 %v824_v15, %v822_v13  ;;  %v821_v23 = vld [vmem:[#allocation8 + $0x20] sm:$0xff]  ;;  %v823_v24 = vld [vmem:[#allocation8 + $0x30] sm:$0xff]  ;;  %v742_v26 = vld [vmem:[#allocation7] sm:$0xff]  ;;  %s6153_s15 = smov 64   ;;  %s6154_s29 = smov 120   ;;  %vm1799_vm5 = vcmask 1043456  }
 0x168   : > { %5031 = vmatprep.subr.mxu0 %v6149_v2  ;;  %5369 = vmatprep.subr.bf16.mxu1 %v5368_v10  ;;  %v5374_v25 = vpack.c.bf16 %v823_v24, %v821_v23  ;;  %v900_v36 = vld [vmem:[#allocation10] sm:$0xff]  ;;  %v1138_v41 = vld [vmem:[#allocation11] sm:$0xff]  ;;  %v1139_v42 = vld [vmem:[#allocation11 + $0x8] sm:$0xff]  ;;  %s6155_s22 = smov 112   ;;  %s6156_s0 = smov 104   ;;  %vm1775_vm6 = vcmask 31744  }
 0x169   : > { %732 = vrot.lane.b32.xlu0 %v726_v6, %s7019_s1  ;;  %5371 = vmatpush1.bf16.msra.mxu1 %v5370_v14  ;;  %v979_v44 = vld [vmem:[#allocation10 + $0x8] sm:$0xff]  ;;  %v5386_v45 = vpack.c.bf16 %v1139_v42, %v1138_v41  ;;  %v1140_v46 = vld [vmem:[#allocation11 + $0x10] sm:$0xff]  ;;  %v1060_v49 = vld [vmem:[#allocation10 + $0x10] sm:$0xff]  ;;  %s7020_s30 = smov 24   ;;  %s7060_s26 = sld [smem:[#allocation34_spill]]  ;;  %vm2463_vm7 = vcmask 523264  }
 0x16a   : > { %5373 = vmatprep.subr.bf16.mxu1 %v5372_v17  ;;  %v1141_v47 = vld [vmem:[#allocation11 + $0x18] sm:$0xff]  ;;  %v1294_v59 = vld [vmem:[#allocation11 + $0x20] sm:$0xff]  ;;  %v1295_v60 = vld [vmem:[#allocation11 + $0x28] sm:$0xff]  ;;  %p720_p1 = scmp.lt.s32.totalorder %s7047_s12, 1  ;;  %vm4597_vm8 = vcmask 7168  }
 0x16b   : > { %5032 = vmatpush3.msra.mxu0 %v741_v16  ;;  %v5389_v48 = vpack.c.bf16 %v1141_v47, %v1140_v46  ;;  %v1215_v62 = vld [vmem:[#allocation13] sm:$0xf]  ;;  %v5395_v63 = vpack.c.bf16 %v1295_v60, %v1294_v59  ;;  %v1296_v0 = vld [vmem:[#allocation11 + $0x30] sm:$0xff]  ;;  %v1297_v3 = vld [vmem:[#allocation11 + $0x38] sm:$0xff] }
 0x16c   : > { %5376 = vmatprep.subr.bf16.mxu0 %v6147_v1  ;;  %v5398_v4 = vpack.c.bf16 %v1297_v3, %v1296_v0  ;;  %v1372_v12 = vld [vmem:[#allocation13 + $0x4] sm:$0xf]  ;;  %v2115_v60 = vld [vmem:[#allocation14 + $0x18] sm:$0xff]  ;;  %s7074_s12 = smov (!%p720_p1, %s7047_s12), 1 }
 0x16d   : > { %5375 = vmatpush1.bf16.msra.mxu1 %v5374_v25 }
 0x16e   : > { %5379 = vmatprep.subr.bf16.mxu1 %v6147_v1 }
 0x16f   : > { %s7061_s24 = smov %s7060_s26 }
 0x1d7   : > { %v729_v19 = vpop.permute.xlu0 %728 }
 0x1d8   : > { %v736_v20 = vsel %vm735_vm1, %v725_v18, %v729_v19 }
 0x1db   : > { %v733_v21 = vpop.permute.xlu0 %732 }
 0x1dc   : > { %v738_v22 = vsel %vm737_vm2, %v736_v20, %v733_v21 }
 0x1dd   : > { %5034 = vmatmul.mubr.msk.f32.vlgmr.msra.gmra.mrb[0].mxu0 %vm743_vm3, %v738_v22 }
 0x1de   : > { %5040 = vmatprep.mubr.msk.f32.mxu0 %vm6148_vm0, %v6149_v2 }
 0x2b0   : > { %v813_v27 = vpop.f32.mrb[0].mxu0 }
 0x2b1   : > { %v6645_v28 = vadd.f32 %v813_v27, %v742_v26  ;;  %v5035_v29 = vpop.f32.mrb[1].mxu0 }
 0x2b3   : > { %4800 = vmatmul.mubr.msk.f32.vlgmr.msra.gmra.mrb[0].mxu1 %vm825_vm4, %v6645_v28 }
 0x2b4   : > { %5047 = vmatprep.mubr.msk.f32.mxu1 %vm6148_vm0, %v6149_v2 }
 0x386   : > { %v895_v30 = vpop.f32.mrb[0].mxu1 }
 0x387   : > { %902 = vrot.lane.b32.xlu1 %v895_v30, %s6152_s14  ;;  %v897_v31 = vpop.f32.mrb[1].mxu1 }
 0x388   : > { %1062 = vrot.lane.b32.xlu0 %v897_v31, %s6152_s14 }
 0x3f9   : > { %v903_v32 = vpop.permute.xlu1 %902 }
 0x3fa   : > { %v5377_v33 = vpack.c.bf16 %v903_v32, %v895_v30  ;;  %v5678_v34 = vpack.i.bf16 %v903_v32, %v895_v30  ;;  %v1063_v35 = vpop.permute.xlu0 %1062 }
 0x3fb   : > { %v5383_v37 = vpack.c.bf16 %v1063_v35, %v897_v31 }
 0x3fc   : > { %5378 = vmatpush3.bf16.msra.mxu0 %v5377_v33  ;;  %5679 = vrot.lane.b32.xlu1 %v5678_v34, %s6153_s15 }
 0x3fd   : > { %5382 = vmatprep.subr.bf16.mxu0 %v6147_v1 }
 0x3ff   : > { %5041 = vmatmul.mubr.msk.f32.vlgmr.msra.gmra.mrb[2].mxu0 %vm737_vm2, %v900_v36 }
 0x400   : > { %5384 = vmatpush3.bf16.msra.mxu0 %v5383_v37  ;;  %5054 = vmatprep.mubr.msk.f32.mxu0 %vm6148_vm0, %v6149_v2 }
 0x401   : > { %5391 = vmatprep.subr.bf16.mxu0 %v6147_v1 }
 0x403   : > { %5055 = vmatmul.mubr.msk.f32.vlgmr.msra.gmra.mrb[4].mxu0 %vm737_vm2, %v1060_v49 }
 0x404   : > { %5072 = vmatprep.mubr.msk.f32.mxu0 %vm6148_vm0, %v6149_v2 }
 0x46e   : > { %v5680_v38 = vpop.permute.xlu1 %5679 }
 0x46f   : > { %v5682_v39 = vunpack.i.h.bf16 %v5680_v38  ;;  %v5681_v40 = vunpack.i.l.bf16 %v5680_v38 }
 0x471   : > { %v5380_v43 = vpack.c.bf16 %v5682_v39, %v5681_v40 }
 0x473   : > { %5381 = vmatpush3.bf16.msra.mxu1 %v5380_v43 }
 0x474   : > { %5385 = vmatprep.subr.bf16.mxu1 %v6147_v1 }
 0x476   : > { %5048 = vmatmul.mubr.msk.f32.vlgmr.msra.gmra.mrb[2].mxu1 %vm737_vm2, %v979_v44 }
 0x477   : > { %5387 = vmatpush3.bf16.msra.mxu1 %v5386_v45  ;;  %5065 = vmatprep.mubr.msk.f32.mxu1 %vm6148_vm0, %v6149_v2 }
 0x478   : > { %5388 = vmatprep.subr.bf16.mxu1 %v6147_v1 }
 0x47b   : > { %5390 = vmatpush3.bf16.msra.mxu1 %v5389_v48 }
 0x47c   : > { %5400 = vmatprep.subr.bf16.mxu1 %v6147_v1 }
 0x4d2   : > { %v974_v52 = vpop.f32.mrb[2].mxu0 }
 0x4d3   : > { %v5042_v53 = vpop.f32.mrb[3].mxu0 }
 0x4d6   : > { %v1134_v54 = vpop.f32.mrb[4].mxu0 }
 0x4d7   : > { %v5056_v55 = vpop.f32.mrb[5].mxu0 }
 0x549   : > { %v1055_v50 = vpop.f32.mrb[2].mxu1 }
 0x54a   : > { %v5049_v51 = vpop.f32.mrb[3].mxu1  ;;  %5066 = vmatmul.mubr.msk.f32.vlgmr.msra.gmra.mrb[4].mxu1 %vm825_vm4, %v1055_v50 }
 0x54b   : > { %5090 = vmatprep.mubr.msk.f32.mxu1 %vm6148_vm0, %v6149_v2 }
 0x61d   : > { %v1211_v56 = vpop.f32.mrb[4].mxu1 }
 0x61e   : > { %1217 = vrot.lane.b32.xlu1 %v1211_v56, %s6152_s14  ;;  %v5067_v57 = vpop.f32.mrb[5].mxu1 }
 0x61f   : > { %v2113_v57 = vld [vmem:[#allocation14 + $0x8] sm:$0xff] }
 0x690   : > { %v1218_v58 = vpop.permute.xlu1 %1217 }
 0x691   : > { %v5392_v61 = vpack.c.bf16 %v1218_v58, %v1211_v56  ;;  %v2112_v56 = vld [vmem:[#allocation14] sm:$0xff]  ;;  %v2114_v58 = vld [vmem:[#allocation14 + $0x10] sm:$0xff] }
 0x692   : > { %v5404_v59 = vpack.c.bf16 %v2113_v57, %v2112_v56  ;;  %v2461_v57 = vld [vmem:[#allocation19 + $0x30] sm:$0xff] }
 0x693   : > { %5393 = vmatpush3.bf16.msra.mxu0 %v5392_v61  ;;  %v5407_v61 = vpack.c.bf16 %v2115_v60, %v2114_v58  ;;  %v2462_v58 = vld [vmem:[#allocation19 + $0x38] sm:$0xff] }
 0x694   : > { %5394 = vmatprep.subr.bf16.mxu0 %v6147_v1 }
 0x696   : > { %5073 = vmatmul.mubr.msk.f32.vlgmr.msra.gmra.mrb[6].mxu0 %vm737_vm2, %v1215_v62 }
 0x697   : > { %5396 = vmatpush3.bf16.msra.mxu0 %v5395_v63  ;;  %5083 = vmatprep.mubr.msk.f32.mxu0 %vm6148_vm0, %v6149_v2 }
 0x698   : > { %5397 = vmatprep.subr.bf16.mxu0 %v6147_v1 }
 0x69b   : > { %5399 = vmatpush3.bf16.msra.mxu0 %v5398_v4 }
 0x69c   : > { %5098 = vmatprep.subr.mxu0 %v6149_v2 }
 0x69e   : > { %5084 = vmatmul.mubr.msk.f32.vlgmr.msra.gmra.mrb[8].mxu0 %vm825_vm4, %v1134_v54 }
 0x69f   : > { %5100 = vmatprep.mubr.msk.f32.mxu0 %vm6148_vm0, %v6149_v2 }
 0x769   : > { %v1289_v5 = vpop.f32.mrb[6].mxu0 }
 0x76a   : > { %1458 = vrot.lane.b32.xlu1 %v1289_v5, %s6154_s29  ;;  %v5074_v6 = vpop.f32.mrb[7].mxu0 }
 0x76e   : > { %1460 = vrot.lane.b32.xlu1 %v1289_v5, %s6155_s22 }
 0x771   : > { %v1367_v7 = vpop.f32.mrb[8].mxu0 }
 0x772   : > { %1453 = vrot.lane.b32.xlu1 %v974_v52, %s6155_s22  ;;  %1374 = vrot.lane.b32.xlu0 %v1367_v7, %s6152_s14  ;;  %v5085_v8 = vpop.f32.mrb[9].mxu0 }
 0x776   : > { %1451 = vrot.lane.b32.xlu0 %v974_v52, %s6154_s29 }
 0x77a   : > { %1462 = vrot.lane.b32.xlu0 %v1289_v5, %s6156_s0 }
 0x77e   : > { %1455 = vrot.lane.b32.xlu0 %v974_v52, %s6156_s0 }
 0x7dc   : > { %v1459_v9 = vpop.permute.xlu1 %1458 }
 0x7dd   : > { %5099 = vmatpush3.xpose.msk.msra.mxu0 %vm735_vm1, %v1459_v9 }
 0x7de   : > { %5108 = vmatprep.subr.mxu0 %v6149_v2 }
 0x7e0   : > { %v1461_v15 = vpop.permute.xlu1 %1460 }
 0x7e4   : > { %v1375_v10 = vpop.permute.xlu0 %1374  ;;  %v1454_v17 = vpop.permute.xlu1 %1453 }
 0x7e5   : > { %v5401_v11 = vpack.c.bf16 %v1375_v10, %v1367_v7 }
 0x7e7   : > { %5402 = vmatpush3.bf16.msra.mxu1 %v5401_v11 }
 0x7e8   : > { %v1452_v13 = vpop.permute.xlu0 %1451  ;;  %5093 = vmatprep.subr.mxu1 %v6149_v2 }
 0x7e9   : > { %5101 = vmatmul.mubr.msk.f32.vlgmr.msra.gmra.mrb[10].mxu0 %vm735_vm1, %v1452_v13 }
 0x7ea   : > { %5091 = vmatmul.mubr.msk.f32.vlgmr.msra.gmra.mrb[6].mxu1 %vm737_vm2, %v1372_v12  ;;  %5110 = vmatprep.mubr.msk.f32.mxu0 %vm6148_vm0, %v6149_v2 }
 0x7eb   : > { %5095 = vmatprep.mubr.msk.f32.mxu1 %vm6148_vm0, %v6149_v2 }
 0x7ec   : > { %v1463_v14 = vpop.permute.xlu0 %1462 }
 0x7ed   : > { %5109 = vmatpush3.xpose.msk.msra.mxu0 %vm735_vm1, %v1463_v14 }
 0x7ee   : > { %5118 = vmatprep.subr.mxu0 %v6149_v2 }
 0x7f0   : > { %5094 = vmatpush3.xpose.msk.msra.mxu1 %vm735_vm1, %v1289_v5  ;;  %v1456_v16 = vpop.permute.xlu0 %1455 }
 0x7f1   : > { %5111 = vmatmul.mubr.msk.f32.vlgmr.msra.gmra.mrb[12].mxu0 %vm735_vm1, %v1456_v16  ;;  %5103 = vmatprep.subr.mxu1 %v6149_v2 }
 0x7f2   : > { %5120 = vmatprep.mubr.msk.f32.mxu0 %vm6148_vm0, %v6149_v2 }
 0x7f3   : > { %5096 = vmatmul.mubr.msk.f32.vlgmr.msra.gmra.mrb[8].mxu1 %vm735_vm1, %v974_v52 }
 0x7f4   : > { %5104 = vmatpush3.xpose.msk.msra.mxu1 %vm735_vm1, %v1461_v15  ;;  %5105 = vmatprep.mubr.msk.f32.mxu1 %vm6148_vm0, %v6149_v2 }
 0x7f5   : > { %5113 = vmatprep.subr.mxu1 %v6149_v2 }
 0x7f7   : > { %5106 = vmatmul.mubr.msk.f32.vlgmr.msra.gmra.mrb[10].mxu1 %vm735_vm1, %v1454_v17 }
 0x7f8   : > { %5115 = vmatprep.mubr.msk.f32.mxu1 %vm6148_vm0, %v6149_v2 }
 0x8bc   : > { %v1615_v18 = vpop.f32.mrb[10].mxu0 }
 0x8bd   : > { %v1769_v19 = vmul.f32 1.442695, %v1615_v18  ;;  %v5102_v20 = vpop.f32.mrb[11].mxu0  ;;  %v1446_v21 = vpop.f32.mrb[6].mxu1  ;;  %v2189_v18 = vld [vmem:[#allocation16] sm:$0xff] }
 0x8be   : > { %v5092_v22 = vpop.f32.mrb[7].mxu1  ;;  %5114 = vmatpush3.msk.msra.mxu1 %vm1799_vm5, %v1446_v21 }
 0x8bf   : > { %5688 = vpow2.f32 %v1769_v19  ;;  %5123 = vmatprep.subr.mxu1 %v6149_v2 }
 0x8c4   : > { %v1763_v23 = vpop.f32.mrb[12].mxu0 }
 0x8c5   : > { %v1773_v24 = vmul.f32 1.442695, %v1763_v23  ;;  %v5112_v25 = vpop.f32.mrb[13].mxu0 }
 0x8c6   : > { %v1541_v26 = vpop.f32.mrb[8].mxu1 }
 0x8c7   : > { %5690 = vpow2.f32 %v1773_v24  ;;  %v1767_v27 = vmul.f32 1.442695, %v1541_v26  ;;  %v5097_v29 = vpop.f32.mrb[9].mxu1 }
 0x8c8   : > { %v2299_v29 = vld [vmem:[%s7060_s26] sm:$0xff]  ;;  %s7068_s26 = sld [smem:[#allocation38_spill]] }
 0x8c9   : > { %v5689_v30 = vpop.eup %5688  ;;  %5692 = vpow2.f32 %v1767_v27 }
 0x8ca   : > { %v1689_v31 = vpop.f32.mrb[10].mxu1  ;;  %v1779_v32 = vsel %vm1775_vm6, %v5689_v30, 0.0 }
 0x8cb   : > { %v1771_v33 = vmul.f32 1.442695, %v1689_v31  ;;  %v5107_v34 = vpop.f32.mrb[11].mxu1  ;;  %1780 = vadd.xlane.f32.xlu0 %v1779_v32  ;;  %v2301_v31 = vld [vmem:[%s7061_s24 + $0x10] sm:$0xff]  ;;  %v2302_v32 = vld [vmem:[%s7061_s24 + $0x18] sm:$0xff] }
 0x8cd   : > { %5694 = vpow2.f32 %v1771_v33  ;;  %v5416_v33 = vpack.c.bf16 %v2302_v32, %v2301_v31  ;;  %v4832_v31 = vld [vmem:[#allocation20 + $0x2] ss:$0 sm:$0xff] }
 0x8d1   : > { %v5691_v35 = vpop.eup %5690 }
 0x8d2   : > { %v1785_v36 = vsel %vm1775_vm6, %v5691_v35, 0.0 }
 0x8d3   : > { %v5693_v37 = vpop.eup %5692  ;;  %1786 = vadd.xlane.f32.xlu1 %v1785_v36 }
 0x8d4   : > { %v1776_v38 = vsel %vm1775_vm6, %v5693_v37, 0.0 }
 0x8d7   : > { %v5695_v39 = vpop.eup %5694  ;;  %1777 = vadd.xlane.f32.xlu1 %v1776_v38  ;;  %v4826_v38 = vld [vmem:[#allocation20] ss:$0 sm:$0xff] }
 0x8d8   : > { %v1782_v40 = vsel %vm1775_vm6, %v5695_v39, 0.0 }
 0x8d9   : > { %1783 = vadd.xlane.f32.xlu0 %v1782_v40  ;;  %v4827_v40 = vld [vmem:[#allocation20 + $0x1] ss:$0 sm:$0xff] }
 0x8e8   : > { %1467 = vrot.lane.b32.xlu1 %v1446_v21, %s6155_s22 }
 0x8ec   : > { %1469 = vrot.lane.b32.xlu1 %v1446_v21, %s6156_s0 }
 0x8ef   : > { %1465 = vrot.lane.b32.xlu0 %v1446_v21, %s6154_s29 }
 0x958   : > { %v1781_v41 = vpop.xlane.xlu0 %1780 }
 0x959   : > { %5696 = vrcp.f32 %v1781_v41 }
 0x960   : > { %v1787_v42 = vpop.xlane.xlu1 %1786 }
 0x961   : > { %5698 = vrcp.f32 %v1787_v42 }
 0x963   : > { %v5697_v45 = vpop.eup %5696 }
 0x964   : > { %v1778_v43 = vpop.xlane.xlu1 %1777  ;;  %v1793_v47 = vmul.f32 %v5697_v45, %v5689_v30  ;;  %v2300_v30 = vld [vmem:[%s7061_s24 + $0x8] sm:$0xff] }
 0x965   : > { %5700 = vrcp.f32 %v1778_v43 }
 0x966   : > { %v1784_v44 = vpop.xlane.xlu0 %1783 }
 0x967   : > { %5702 = vrcp.f32 %v1784_v44 }
 0x968   : > { %v1468_v46 = vpop.permute.xlu1 %1467 }
 0x96a   : > { %v1466_v48 = vpop.permute.xlu0 %1465 }
 0x96b   : > { %v5699_v49 = vpop.eup %5698  ;;  %5119 = vmatpush3.msk.msra.mxu0 %vm1799_vm5, %v1466_v48 }
 0x96c   : > { %5121 = vmatmul.mubr.msk.f32.vlgmr.msra.gmra.mrb[14].mxu0 %vm1775_vm6, %v1793_v47  ;;  %5128 = vmatprep.subr.mxu0 %v6149_v2  ;;  %v1470_v50 = vpop.permute.xlu1 %1469  ;;  %v1795_v51 = vmul.f32 %v5699_v49, %v5691_v35  ;;  %v2456_v47 = vld [vmem:[#allocation19 + $0x8] sm:$0xff]  ;;  %v2376_v49 = vld [vmem:[#allocation17] sm:$0xff] }
 0x96d   : > { %5129 = vmatpush3.msk.msra.mxu0 %vm1799_vm5, %v1470_v50  ;;  %5130 = vmatprep.mubr.msk.f32.mxu0 %vm6148_vm0, %v6149_v2 }
 0x96e   : > { %5409 = vmatprep.subr.bf16.mxu0 %v6147_v1 }
 0x96f   : > { %v5701_v52 = vpop.eup %5700 }
 0x970   : > { %v1792_v53 = vmul.f32 %v5701_v52, %v5693_v37  ;;  %5131 = vmatmul.mubr.msk.f32.vlgmr.msra.gmra.mrb[16].mxu0 %vm1775_vm6, %v1795_v51  ;;  %v2457_v51 = vld [vmem:[#allocation19 + $0x10] sm:$0xff]  ;;  %v2458_v52 = vld [vmem:[#allocation19 + $0x18] sm:$0xff] }
 0x971   : > { %v5703_v54 = vpop.eup %5702  ;;  %5148 = vmatprep.mubr.msk.f32.mxu0 %vm6148_vm0, %v6149_v2 }
 0x972   : > { %5116 = vmatmul.mubr.msk.f32.vlgmr.msra.gmra.mrb[12].mxu1 %vm1775_vm6, %v1792_v53  ;;  %v1794_v55 = vmul.f32 %v5703_v54, %v5695_v39  ;;  %v5425_v53 = vpack.c.bf16 %v2458_v52, %v2457_v51  ;;  %v2459_v54 = vld [vmem:[#allocation19 + $0x20] sm:$0xff] }
 0x973   : > { %5124 = vmatpush3.msk.msra.mxu1 %vm1799_vm5, %v1468_v46  ;;  %5125 = vmatprep.mubr.msk.f32.mxu1 %vm6148_vm0, %v6149_v2  ;;  %v2455_v46 = vld [vmem:[#allocation19] sm:$0xff] }
 0x974   : > { %5403 = vmatprep.subr.bf16.mxu1 %v6147_v1  ;;  %v5422_v50 = vpack.c.bf16 %v2456_v47, %v2455_v46  ;;  %v2970_v47 = vld [vmem:[#allocation11 + $0x40] sm:$0xff]  ;;  %v2972_v52 = vld [vmem:[#allocation11 + $0x50] sm:$0xff] }
 0x976   : > { %5126 = vmatmul.mubr.msk.f32.vlgmr.msra.gmra.mrb[14].mxu1 %vm1775_vm6, %v1794_v55  ;;  %v2460_v55 = vld [vmem:[#allocation19 + $0x28] sm:$0xff] }
 0x977   : > { %5141 = vmatprep.mubr.msk.f32.mxu1 %vm6148_vm0, %v6149_v2  ;;  %5405 = vmatpush3.bf16.msra.mxu1 %v5404_v59  ;;  %v5428_v56 = vpack.c.bf16 %v2460_v55, %v2459_v54  ;;  %v5431_v59 = vpack.c.bf16 %v2462_v58, %v2461_v57  ;;  %v2891_v55 = vld [vmem:[#allocation10 + $0x28] sm:$0xff] }
 0x978   : > { %5406 = vmatprep.subr.bf16.mxu1 %v6147_v1 }
 0x97b   : > { %5408 = vmatpush3.bf16.msra.mxu1 %v5407_v61 }
 0x97c   : > { %5418 = vmatprep.subr.bf16.mxu1 %v6147_v1 }
 0xa3f   : > { %v1943_v62 = vpop.f32.mrb[14].mxu0 }
 0xa40   : > { %2098 = vrot.lane.b32.xlu0 %v1943_v62, %s7021_s21  ;;  %v5122_v63 = vpop.f32.mrb[15].mxu0 }
 0xa43   : > { %v2093_v0 = vpop.f32.mrb[16].mxu0 }
 0xa44   : > { %2106 = vrot.lane.b32.xlu0 %v2093_v0, %s7020_s30  ;;  %v5132_v3 = vpop.f32.mrb[17].mxu0  ;;  %s7062_s30 = sld [smem:[#allocation35_spill]] }
 0xa45   : > { %v1868_v4 = vpop.f32.mrb[12].mxu1 }
 0xa46   : > { %v5117_v5 = vpop.f32.mrb[13].mxu1 }
 0xa49   : > { %v2018_v6 = vpop.f32.mrb[14].mxu1 }
 0xa4a   : > { %2102 = vrot.lane.b32.xlu1 %v2018_v6, %s7019_s1  ;;  %v5127_v7 = vpop.f32.mrb[15].mxu1  ;;  %v2537_v5 = vld [vmem:[%s7062_s30] sm:$0xff] }
 0xab2   : > { %v2099_v8 = vpop.permute.xlu0 %2098 }
 0xab3   : > { %v2109_v9 = vsel %vm735_vm1, %v1868_v4, %v2099_v8 }
 0xab6   : > { %v2107_v11 = vpop.permute.xlu0 %2106 }
 0xabc   : > { %v2103_v10 = vpop.permute.xlu1 %2102 }
 0xabd   : > { %v2110_v12 = vsel %vm737_vm2, %v2109_v9, %v2103_v10 }
 0xabe   : > { %v2111_v13 = vsel %vm743_vm3, %v2110_v12, %v2107_v11 }
 0xabf   : > { %5142 = vmatmul.mubr.msk.f32.vlgmr.msra.gmra.mrb[16].mxu1 %vm825_vm4, %v2111_v13 }
 0xac0   : > { %5166 = vmatprep.mubr.msk.f32.mxu1 %vm6148_vm0, %v6149_v2 }
 0xb92   : > { %v2185_v14 = vpop.f32.mrb[16].mxu1 }
 0xb93   : > { %2191 = vrot.lane.b32.xlu1 %v2185_v14, %s6152_s14  ;;  %v5143_v15 = vpop.f32.mrb[17].mxu1 }
 0xb94   : > { %v2649_v15 = vld [vmem:[#allocation8 + $0x48] sm:$0xff] }
 0xc05   : > { %v2192_v16 = vpop.permute.xlu1 %2191 }
 0xc06   : > { %v5410_v17 = vpack.c.bf16 %v2192_v16, %v2185_v14  ;;  %v2651_v16 = vld [vmem:[#allocation8 + $0x58] sm:$0xff] }
 0xc08   : > { %5411 = vmatpush3.bf16.msra.mxu0 %v5410_v17  ;;  %v5436_v17 = vpack.c.bf16 %v2651_v16, %v2649_v15 }
 0xc09   : > { %5412 = vmatprep.subr.bf16.mxu0 %v6147_v1 }
 0xc0b   : > { %5149 = vmatmul.mubr.msk.f32.vlgmr.msra.gmra.mrb[18].mxu0 %vm737_vm2, %v2189_v18  ;;  %v2648_v18 = vld [vmem:[#allocation8 + $0x40] sm:$0xff] }
 0xc0c   : > { %5159 = vmatprep.mubr.msk.f32.mxu0 %vm6148_vm0, %v6149_v2 }
 0xcde   : > { %v2263_v19 = vpop.f32.mrb[18].mxu0 }
 0xcdf   : > { %v2267_v20 = vadd.f32 %v2263_v19, %v6645_v28  ;;  %v5150_v21 = vpop.f32.mrb[19].mxu0  ;;  %v5413_v28 = vpack.c.bf16 %v2300_v30, %v2299_v29  ;;  %v2650_v19 = vld [vmem:[#allocation8 + $0x50] sm:$0xff] }
 0xce0   : > { %v2653_v21 = vld [vmem:[#allocation8 + $0x68] sm:$0xff] }
 0xce1   : > { %v2271_v22 = vsel %vm825_vm4, %v2267_v20, 0.0  ;;  %5414 = vmatpush3.bf16.msra.mxu0 %v5413_v28 }
 0xce2   : > { %2272 = vadd.xlane.f32.xlu0 %v2271_v22  ;;  %5415 = vmatprep.subr.bf16.mxu0 %v6147_v1  ;;  %v2655_v22 = vld [vmem:[#allocation8 + $0x78] sm:$0xff] }
 0xce5   : > { %5417 = vmatpush3.bf16.msra.mxu0 %v5416_v33  ;;  %v4833_v33 = vld [vmem:[#allocation20 + $0x3] ss:$0 sm:$0xff] }
 0xce6   : > { %5433 = vmatprep.subr.bf16.mxu0 %v6147_v1 }
 0xd6f   : > { %v2273_v23 = vpop.xlane.xlu0 %2272 }
 0xd70   : > { %v2275_v24 = vmul.f32 0.03125, %v2273_v23  ;;  %v2652_v23 = vld [vmem:[#allocation8 + $0x60] sm:$0xff] }
 0xd72   : > { %v2276_v25 = vsub.f32 %v2267_v20, %v2275_v24  ;;  %v5438_v20 = vpack.c.bf16 %v2650_v19, %v2648_v18  ;;  %v5440_v24 = vpack.c.bf16 %v2655_v22, %v2653_v21  ;;  %v3205_v18 = vld [vmem:[#allocation13 + $0xc] sm:$0xf] }
 0xd74   : > { %v2277_v26 = vmul.f32 %v2276_v25, %v2276_v25 }
 0xd76   : > { %v2278_v27 = vsel %vm825_vm4, %v2277_v26, 0.0 }
 0xd77   : > { %2279 = vadd.xlane.f32.xlu1 %v2278_v27 }
 0xe04   : > { %v2280_v34 = vpop.xlane.xlu1 %2279 }
 0xe05   : > { %v2281_v35 = vmul.f32 0.03125, %v2280_v34 }
 0xe07   : > { %v2282_v36 = vadd.f32 1e-05, %v2281_v35 }
 0xe09   : > { %5704 = vrsqrt.f32 %v2282_v36 }
 0xe13   : > { %v5705_v37 = vpop.eup %5704 }
 0xe14   : > { %v2284_v39 = vmul.f32 %v5705_v37, %v2276_v25  ;;  %v2654_v25 = vld [vmem:[#allocation8 + $0x70] sm:$0xff] }
 0xe15   : > { %v5442_v26 = vpack.c.bf16 %v2654_v25, %v2652_v23 }
 0xe16   : > { %v2291_v41 = vmul.f32 %v4826_v38, %v2284_v39 }
 0xe18   : > { %v2298_v42 = vadd.f32 %v4827_v40, %v2291_v41  ;;  %v2731_v41 = vld [vmem:[#allocation10 + $0x18] sm:$0xff] }
 0xe1a   : > { %5160 = vmatmul.mubr.msk.f32.vlgmr.msra.gmra.mrb[20].mxu0 %vm825_vm4, %v2298_v42 }
 0xe1b   : > { %5192 = vmatprep.mubr.msk.f32.mxu0 %vm6148_vm0, %v6149_v2 }
 0xeed   : > { %v2372_v43 = vpop.f32.mrb[20].mxu0 }
 0xeee   : > { %2378 = vrot.lane.b32.xlu0 %v2372_v43, %s6153_s15  ;;  %v5161_v44 = vpop.f32.mrb[21].mxu0 }
 0xf60   : > { %v2379_v45 = vpop.permute.xlu0 %2378 }
 0xf61   : > { %v5419_v48 = vpack.c.bf16 %v2379_v45, %v2372_v43 }
 0xf63   : > { %5420 = vmatpush3.bf16.msra.mxu1 %v5419_v48  ;;  %v2971_v48 = vld [vmem:[#allocation11 + $0x48] sm:$0xff] }
 0xf64   : > { %5421 = vmatprep.subr.bf16.mxu1 %v6147_v1  ;;  %v5454_v51 = vpack.c.bf16 %v2971_v48, %v2970_v47 }
 0xf66   : > { %5167 = vmatmul.mubr.msk.f32.vlgmr.msra.gmra.mrb[18].mxu1 %vm737_vm2, %v2376_v49 }
 0xf67   : > { %5423 = vmatpush3.bf16.msra.mxu1 %v5422_v50  ;;  %5185 = vmatprep.mubr.msk.f32.mxu1 %vm6148_vm0, %v6149_v2  ;;  %v2810_v50 = vld [vmem:[#allocation10 + $0x20] sm:$0xff] }
 0xf68   : > { %5424 = vmatprep.subr.bf16.mxu1 %v6147_v1 }
 0xf6b   : > { %5426 = vmatpush3.bf16.msra.mxu1 %v5425_v53  ;;  %v2973_v53 = vld [vmem:[#allocation11 + $0x58] sm:$0xff] }
 0xf6c   : > { %5427 = vmatprep.subr.bf16.mxu1 %v6147_v1  ;;  %v5457_v54 = vpack.c.bf16 %v2973_v53, %v2972_v52 }
 0xf6f   : > { %5429 = vmatpush3.bf16.msra.mxu1 %v5428_v56 }
 0xf70   : > { %5430 = vmatprep.subr.bf16.mxu1 %v6147_v1 }
 0xf73   : > { %5432 = vmatpush3.bf16.msra.mxu1 %v5431_v59 }
 0xf74   : > { %5447 = vmatprep.subr.bf16.mxu1 %v6147_v1 }
0x1039   : > { %v2450_v60 = vpop.f32.mrb[18].mxu1 }
0x103a   : > { %v2454_v61 = vmax.f32 %v2450_v60, 0.0  ;;  %v5168_v62 = vpop.f32.mrb[19].mxu1 }
0x103c   : > { %5186 = vmatmul.mubr.msk.f32.vlgmr.msra.gmra.mrb[20].mxu1 %vm2463_vm7, %v2454_v61 }
0x103d   : > { %5206 = vmatprep.mubr.msk.f32.mxu1 %vm6148_vm0, %v6149_v2 }
0x110f   : > { %v2533_v63 = vpop.f32.mrb[20].mxu1 }
0x1110   : > { %2539 = vrot.lane.b32.xlu1 %v2533_v63, %s6152_s14  ;;  %v5187_v0 = vpop.f32.mrb[21].mxu1 }
0x1182   : > { %v2540_v3 = vpop.permute.xlu1 %2539 }
0x1183   : > { %v5434_v4 = vpack.c.bf16 %v2540_v3, %v2533_v63  ;;  %v3127_v3 = vld [vmem:[#allocation11 + $0x60] sm:$0xff] }
0x1185   : > { %5435 = vmatpush3.bf16.msra.mxu0 %v5434_v4  ;;  %v3128_v4 = vld [vmem:[#allocation11 + $0x68] sm:$0xff] }
0x1186   : > { %5437 = vmatprep.subr.bf16.mxu0 %v5436_v17 }
0x1188   : > { %5193 = vmatmul.mubr.msk.f32.vlgmr.msra.gmra.mrb[22].mxu0 %vm737_vm2, %v2537_v5 }
0x1189   : > { %2723 = vmatprep.mubr.f32.mxu0 %v6149_v2  ;;  %5439 = vmatpush1.bf16.msra.mxu0 %v5438_v20 }
0x118a   : > { %5441 = vmatprep.subr.bf16.mxu0 %v5440_v24 }
0x118d   : > { %5443 = vmatpush1.bf16.msra.mxu0 %v5442_v26 }
0x118e   : > { %5444 = vmatprep.subr.bf16.mxu0 %v6147_v1 }
0x125b   : > { %v2611_v6 = vpop.f32.mrb[22].mxu0 }
0x125c   : > { %v2615_v7 = vadd.f32 %v2611_v6, %v2298_v42  ;;  %v5194_v8 = vpop.f32.mrb[23].mxu0  ;;  %v3048_v6 = vld [vmem:[#allocation13 + $0x8] sm:$0xf] }
0x125d   : > { %v3129_v8 = vld [vmem:[#allocation11 + $0x70] sm:$0xff] }
0x125e   : > { %v2620_v9 = vsel %vm825_vm4, %v2615_v7, 0.0 }
0x125f   : > { %2621 = vadd.xlane.f32.xlu0 %v2620_v9  ;;  %v3130_v9 = vld [vmem:[#allocation11 + $0x78] sm:$0xff] }
0x12ec   : > { %v2622_v10 = vpop.xlane.xlu0 %2621 }
0x12ed   : > { %v2623_v11 = vmul.f32 0.03125, %v2622_v10  ;;  %v5466_v10 = vpack.c.bf16 %v3130_v9, %v3129_v8 }
0x12ef   : > { %v2624_v12 = vsub.f32 %v2615_v7, %v2623_v11  ;;  %v5463_v7 = vpack.c.bf16 %v3128_v4, %v3127_v3  ;;  %v3947_v4 = vld [vmem:[#allocation14 + $0x38] sm:$0xff] }
0x12f1   : > { %v2625_v13 = vmul.f32 %v2624_v12, %v2624_v12 }
0x12f3   : > { %v2626_v14 = vsel %vm825_vm4, %v2625_v13, 0.0 }
0x12f4   : > { %2627 = vadd.xlane.f32.xlu1 %v2626_v14 }
0x1381   : > { %v2628_v27 = vpop.xlane.xlu1 %2627 }
0x1382   : > { %v2629_v29 = vmul.f32 0.03125, %v2628_v27 }
0x1384   : > { %v2630_v30 = vadd.f32 1e-05, %v2629_v29 }
0x1386   : > { %5706 = vrsqrt.f32 %v2630_v30 }
0x1390   : > { %v5707_v28 = vpop.eup %5706 }
0x1391   : > { %v2632_v32 = vmul.f32 %v5707_v28, %v2624_v12 }
0x1393   : > { %v2639_v34 = vmul.f32 %v4832_v31, %v2632_v32 }
0x1395   : > { %v6796_v35 = vadd.f32 %v4833_v33, %v2639_v34 }
0x1397   : > { %4834 = vmatmul.mubr.msk.f32.vlgmr.msra.gmra.mrb[24].mxu0 %vm825_vm4, %v6796_v35 }
0x1398   : > { %5199 = vmatprep.mubr.msk.f32.mxu0 %vm6148_vm0, %v6149_v2 }
0x146a   : > { %v2725_v36 = vpop.f32.mrb[24].mxu0 }
0x146b   : > { %2733 = vrot.lane.b32.xlu0 %v2725_v36, %s6152_s14  ;;  %v2727_v37 = vpop.f32.mrb[25].mxu0 }
0x146f   : > { %2893 = vrot.lane.b32.xlu0 %v2727_v37, %s6152_s14 }
0x14dd   : > { %v2734_v38 = vpop.permute.xlu0 %2733 }
0x14de   : > { %v5445_v39 = vpack.c.bf16 %v2734_v38, %v2725_v36  ;;  %v5683_v40 = vpack.i.bf16 %v2734_v38, %v2725_v36 }
0x14e0   : > { %5446 = vmatpush3.bf16.msra.mxu0 %v5445_v39  ;;  %5684 = vrot.lane.b32.xlu1 %v5683_v40, %s6153_s15 }
0x14e1   : > { %v2894_v42 = vpop.permute.xlu0 %2893  ;;  %5450 = vmatprep.subr.bf16.mxu0 %v6147_v1 }
0x14e2   : > { %v5451_v43 = vpack.c.bf16 %v2894_v42, %v2727_v37 }
0x14e3   : > { %5200 = vmatmul.mubr.msk.f32.vlgmr.msra.gmra.mrb[26].mxu0 %vm737_vm2, %v2731_v41 }
0x14e4   : > { %5452 = vmatpush3.bf16.msra.mxu0 %v5451_v43  ;;  %5213 = vmatprep.mubr.msk.f32.mxu0 %vm6148_vm0, %v6149_v2 }
0x14e5   : > { %5459 = vmatprep.subr.bf16.mxu0 %v6147_v1 }
0x14e7   : > { %5214 = vmatmul.mubr.msk.f32.vlgmr.msra.gmra.mrb[28].mxu0 %vm737_vm2, %v2891_v55 }
0x14e8   : > { %5231 = vmatprep.mubr.msk.f32.mxu0 %vm6148_vm0, %v6149_v2 }
0x1552   : > { %v5685_v44 = vpop.permute.xlu1 %5684 }
0x1553   : > { %v5687_v45 = vunpack.i.h.bf16 %v5685_v44  ;;  %v5686_v46 = vunpack.i.l.bf16 %v5685_v44 }
0x1555   : > { %v5448_v49 = vpack.c.bf16 %v5687_v45, %v5686_v46 }
0x1557   : > { %5449 = vmatpush3.bf16.msra.mxu1 %v5448_v49 }
0x1558   : > { %5453 = vmatprep.subr.bf16.mxu1 %v6147_v1 }
0x155a   : > { %5207 = vmatmul.mubr.msk.f32.vlgmr.msra.gmra.mrb[22].mxu1 %vm737_vm2, %v2810_v50 }
0x155b   : > { %5455 = vmatpush3.bf16.msra.mxu1 %v5454_v51  ;;  %5224 = vmatprep.mubr.msk.f32.mxu1 %vm6148_vm0, %v6149_v2 }
0x155c   : > { %5456 = vmatprep.subr.bf16.mxu1 %v6147_v1 }
0x155f   : > { %5458 = vmatpush3.bf16.msra.mxu1 %v5457_v54 }
0x1560   : > { %5468 = vmatprep.subr.bf16.mxu1 %v6147_v1 }
0x15b6   : > { %v2805_v58 = vpop.f32.mrb[26].mxu0 }
0x15b7   : > { %v5201_v59 = vpop.f32.mrb[27].mxu0 }
0x15ba   : > { %v2965_v60 = vpop.f32.mrb[28].mxu0 }
0x15bb   : > { %v5215_v61 = vpop.f32.mrb[29].mxu0 }
0x162d   : > { %v2886_v56 = vpop.f32.mrb[22].mxu1 }
0x162e   : > { %v5208_v57 = vpop.f32.mrb[23].mxu1  ;;  %5225 = vmatmul.mubr.msk.f32.vlgmr.msra.gmra.mrb[24].mxu1 %vm825_vm4, %v2886_v56 }
0x162f   : > { %5249 = vmatprep.mubr.msk.f32.mxu1 %vm6148_vm0, %v6149_v2 }
0x1701   : > { %v3043_v62 = vpop.f32.mrb[24].mxu1 }
0x1702   : > { %3050 = vrot.lane.b32.xlu1 %v3043_v62, %s6152_s14  ;;  %v5226_v63 = vpop.f32.mrb[25].mxu1 }
0x1703   : > { %v3945_v63 = vld [vmem:[#allocation14 + $0x28] sm:$0xff] }
0x1774   : > { %v3051_v0 = vpop.permute.xlu1 %3050 }
0x1775   : > { %v5460_v5 = vpack.c.bf16 %v3051_v0, %v3043_v62  ;;  %v3944_v62 = vld [vmem:[#allocation14 + $0x20] sm:$0xff]  ;;  %v3946_v0 = vld [vmem:[#allocation14 + $0x30] sm:$0xff] }
0x1776   : > { %v5472_v3 = vpack.c.bf16 %v3945_v63, %v3944_v62  ;;  %v4297_v63 = vld [vmem:[#allocation19 + $0x70] sm:$0xff] }
0x1777   : > { %5461 = vmatpush3.bf16.msra.mxu0 %v5460_v5  ;;  %v5475_v5 = vpack.c.bf16 %v3947_v4, %v3946_v0  ;;  %v4298_v0 = vld [vmem:[#allocation19 + $0x78] sm:$0xff] }
0x1778   : > { %5462 = vmatprep.subr.bf16.mxu0 %v6147_v1 }
0x177a   : > { %5232 = vmatmul.mubr.msk.f32.vlgmr.msra.gmra.mrb[30].mxu0 %vm737_vm2, %v3048_v6 }
0x177b   : > { %5464 = vmatpush3.bf16.msra.mxu0 %v5463_v7  ;;  %5242 = vmatprep.mubr.msk.f32.mxu0 %vm6148_vm0, %v6149_v2 }
0x177c   : > { %5465 = vmatprep.subr.bf16.mxu0 %v6147_v1 }
0x177f   : > { %5467 = vmatpush3.bf16.msra.mxu0 %v5466_v10 }
0x1780   : > { %5257 = vmatprep.subr.mxu0 %v6149_v2 }
0x1782   : > { %5243 = vmatmul.mubr.msk.f32.vlgmr.msra.gmra.mrb[32].mxu0 %vm825_vm4, %v2965_v60 }
0x1783   : > { %5259 = vmatprep.mubr.msk.f32.mxu0 %vm6148_vm0, %v6149_v2 }
0x184d   : > { %v3122_v11 = vpop.f32.mrb[30].mxu0 }
0x184e   : > { %3291 = vrot.lane.b32.xlu1 %v3122_v11, %s6154_s29  ;;  %v5233_v12 = vpop.f32.mrb[31].mxu0 }
0x1852   : > { %3293 = vrot.lane.b32.xlu1 %v3122_v11, %s6155_s22 }
0x1855   : > { %v3200_v13 = vpop.f32.mrb[32].mxu0 }
0x1856   : > { %3286 = vrot.lane.b32.xlu1 %v2805_v58, %s6155_s22  ;;  %3207 = vrot.lane.b32.xlu0 %v3200_v13, %s6152_s14  ;;  %v5244_v14 = vpop.f32.mrb[33].mxu0 }
0x185a   : > { %3284 = vrot.lane.b32.xlu0 %v2805_v58, %s6154_s29 }
0x185e   : > { %3295 = vrot.lane.b32.xlu0 %v3122_v11, %s6156_s0 }
0x1862   : > { %3288 = vrot.lane.b32.xlu0 %v2805_v58, %s6156_s0 }
0x18c0   : > { %v3292_v15 = vpop.permute.xlu1 %3291 }
0x18c1   : > { %5258 = vmatpush3.xpose.msk.msra.mxu0 %vm735_vm1, %v3292_v15 }
0x18c2   : > { %5267 = vmatprep.subr.mxu0 %v6149_v2 }
0x18c4   : > { %v3294_v21 = vpop.permute.xlu1 %3293 }
0x18c8   : > { %v3208_v16 = vpop.permute.xlu0 %3207  ;;  %v3287_v23 = vpop.permute.xlu1 %3286 }
0x18c9   : > { %v5469_v17 = vpack.c.bf16 %v3208_v16, %v3200_v13 }
0x18cb   : > { %5470 = vmatpush3.bf16.msra.mxu1 %v5469_v17 }
0x18cc   : > { %v3285_v19 = vpop.permute.xlu0 %3284  ;;  %5252 = vmatprep.subr.mxu1 %v6149_v2 }
0x18cd   : > { %5260 = vmatmul.mubr.msk.f32.vlgmr.msra.gmra.mrb[34].mxu0 %vm735_vm1, %v3285_v19 }
0x18ce   : > { %5250 = vmatmul.mubr.msk.f32.vlgmr.msra.gmra.mrb[26].mxu1 %vm737_vm2, %v3205_v18  ;;  %5269 = vmatprep.mubr.msk.f32.mxu0 %vm6148_vm0, %v6149_v2 }
0x18cf   : > { %5254 = vmatprep.mubr.msk.f32.mxu1 %vm6148_vm0, %v6149_v2 }
0x18d0   : > { %v3296_v20 = vpop.permute.xlu0 %3295 }
0x18d1   : > { %5268 = vmatpush3.xpose.msk.msra.mxu0 %vm735_vm1, %v3296_v20 }
0x18d2   : > { %5277 = vmatprep.subr.mxu0 %v6149_v2 }
0x18d4   : > { %5253 = vmatpush3.xpose.msk.msra.mxu1 %vm735_vm1, %v3122_v11  ;;  %v3289_v22 = vpop.permute.xlu0 %3288 }
0x18d5   : > { %5270 = vmatmul.mubr.msk.f32.vlgmr.msra.gmra.mrb[36].mxu0 %vm735_vm1, %v3289_v22  ;;  %5262 = vmatprep.subr.mxu1 %v6149_v2 }
0x18d6   : > { %5279 = vmatprep.mubr.msk.f32.mxu0 %vm6148_vm0, %v6149_v2 }
0x18d7   : > { %5255 = vmatmul.mubr.msk.f32.vlgmr.msra.gmra.mrb[28].mxu1 %vm735_vm1, %v2805_v58 }
0x18d8   : > { %5263 = vmatpush3.xpose.msk.msra.mxu1 %vm735_vm1, %v3294_v21  ;;  %5264 = vmatprep.mubr.msk.f32.mxu1 %vm6148_vm0, %v6149_v2 }
0x18d9   : > { %5272 = vmatprep.subr.mxu1 %v6149_v2 }
0x18db   : > { %5265 = vmatmul.mubr.msk.f32.vlgmr.msra.gmra.mrb[30].mxu1 %vm735_vm1, %v3287_v23 }
0x18dc   : > { %5274 = vmatprep.mubr.msk.f32.mxu1 %vm6148_vm0, %v6149_v2 }
0x19a0   : > { %v3448_v24 = vpop.f32.mrb[34].mxu0 }
0x19a1   : > { %v3602_v25 = vmul.f32 1.442695, %v3448_v24  ;;  %v5261_v26 = vpop.f32.mrb[35].mxu0  ;;  %v3279_v27 = vpop.f32.mrb[26].mxu1  ;;  %v4022_v24 = vld [vmem:[#allocation16 + $0x8] sm:$0xff] }
0x19a2   : > { %v5251_v29 = vpop.f32.mrb[27].mxu1  ;;  %5273 = vmatpush3.msk.msra.mxu1 %vm1799_vm5, %v3279_v27 }
0x19a3   : > { %5708 = vpow2.f32 %v3602_v25  ;;  %5282 = vmatprep.subr.mxu1 %v6149_v2 }
0x19a8   : > { %v3596_v30 = vpop.f32.mrb[36].mxu0 }
0x19a9   : > { %v3606_v28 = vmul.f32 1.442695, %v3596_v30  ;;  %v5271_v31 = vpop.f32.mrb[37].mxu0 }
0x19aa   : > { %v3374_v32 = vpop.f32.mrb[28].mxu1 }
0x19ab   : > { %5710 = vpow2.f32 %v3606_v28  ;;  %v3600_v33 = vmul.f32 1.442695, %v3374_v32  ;;  %v5256_v34 = vpop.f32.mrb[29].mxu1 }
0x19ac   : > { %v4862_v34 = vld [vmem:[%s7061_s24 + $0x20] sm:$0xff] }
0x19ad   : > { %v5709_v36 = vpop.eup %5708  ;;  %5712 = vpow2.f32 %v3600_v33 }
0x19ae   : > { %v3522_v37 = vpop.f32.mrb[30].mxu1  ;;  %v3611_v38 = vsel %vm1775_vm6, %v5709_v36, 0.0 }
0x19af   : > { %v3604_v39 = vmul.f32 1.442695, %v3522_v37  ;;  %v5266_v40 = vpop.f32.mrb[31].mxu1  ;;  %3612 = vadd.xlane.f32.xlu0 %v3611_v38  ;;  %v4864_v37 = vld [vmem:[%s7061_s24 + $0x30] sm:$0xff]  ;;  %v4865_v38 = vld [vmem:[%s7061_s24 + $0x38] sm:$0xff] }
0x19b1   : > { %5714 = vpow2.f32 %v3604_v39  ;;  %v5484_v39 = vpack.c.bf16 %v4865_v38, %v4864_v37 }
0x19b5   : > { %v5711_v41 = vpop.eup %5710 }
0x19b6   : > { %v3617_v42 = vsel %vm1775_vm6, %v5711_v41, 0.0 }
0x19b7   : > { %v5713_v43 = vpop.eup %5712  ;;  %3618 = vadd.xlane.f32.xlu1 %v3617_v42 }
0x19b8   : > { %v3608_v44 = vsel %vm1775_vm6, %v5713_v43, 0.0 }
0x19bb   : > { %v5715_v45 = vpop.eup %5714  ;;  %3609 = vadd.xlane.f32.xlu1 %v3608_v44  ;;  %v4860_v44 = vld [vmem:[#allocation20 + $0x4] ss:$0 sm:$0xff] }
0x19bc   : > { %v3614_v46 = vsel %vm1775_vm6, %v5715_v45, 0.0 }
0x19bd   : > { %3615 = vadd.xlane.f32.xlu0 %v3614_v46  ;;  %v4861_v46 = vld [vmem:[#allocation20 + $0x5] ss:$0 sm:$0xff] }
0x19cc   : > { %3300 = vrot.lane.b32.xlu1 %v3279_v27, %s6155_s22  ;;  %s7064_s22 = smov 24  }
0x19d0   : > { %3302 = vrot.lane.b32.xlu1 %v3279_v27, %s6156_s0  ;;  %s7065_s0 = smov 16  }
0x19d3   : > { %3298 = vrot.lane.b32.xlu0 %v3279_v27, %s6154_s29  ;;  %s7063_s29 = smov 8  }
0x1a3c   : > { %v3613_v47 = vpop.xlane.xlu0 %3612 }
0x1a3d   : > { %5716 = vrcp.f32 %v3613_v47 }
0x1a44   : > { %v3619_v48 = vpop.xlane.xlu1 %3618 }
0x1a45   : > { %5718 = vrcp.f32 %v3619_v48 }
0x1a47   : > { %v5717_v51 = vpop.eup %5716 }
0x1a48   : > { %v3610_v49 = vpop.xlane.xlu1 %3609  ;;  %v3625_v53 = vmul.f32 %v5717_v51, %v5709_v36  ;;  %v4863_v36 = vld [vmem:[%s7061_s24 + $0x28] sm:$0xff] }
0x1a49   : > { %5720 = vrcp.f32 %v3610_v49 }
0x1a4a   : > { %v3616_v50 = vpop.xlane.xlu0 %3615 }
0x1a4b   : > { %5722 = vrcp.f32 %v3616_v50 }
0x1a4c   : > { %v3301_v52 = vpop.permute.xlu1 %3300 }
0x1a4e   : > { %v3299_v54 = vpop.permute.xlu0 %3298 }
0x1a4f   : > { %v5719_v55 = vpop.eup %5718  ;;  %5278 = vmatpush3.msk.msra.mxu0 %vm1799_vm5, %v3299_v54 }
0x1a50   : > { %5280 = vmatmul.mubr.msk.f32.vlgmr.msra.gmra.mrb[38].mxu0 %vm1775_vm6, %v3625_v53  ;;  %5287 = vmatprep.subr.mxu0 %v6149_v2  ;;  %v3303_v56 = vpop.permute.xlu1 %3302  ;;  %v3627_v57 = vmul.f32 %v5719_v55, %v5711_v41  ;;  %v4292_v53 = vld [vmem:[#allocation19 + $0x48] sm:$0xff]  ;;  %v4211_v55 = vld [vmem:[#allocation17 + $0x8] sm:$0xff] }
0x1a51   : > { %5288 = vmatpush3.msk.msra.mxu0 %vm1799_vm5, %v3303_v56  ;;  %5289 = vmatprep.mubr.msk.f32.mxu0 %vm6148_vm0, %v6149_v2 }
0x1a52   : > { %5477 = vmatprep.subr.bf16.mxu0 %v6147_v1 }
0x1a53   : > { %v5721_v58 = vpop.eup %5720 }
0x1a54   : > { %v3624_v59 = vmul.f32 %v5721_v58, %v5713_v43  ;;  %5290 = vmatmul.mubr.msk.f32.vlgmr.msra.gmra.mrb[40].mxu0 %vm1775_vm6, %v3627_v57  ;;  %v4293_v57 = vld [vmem:[#allocation19 + $0x50] sm:$0xff]  ;;  %v4294_v58 = vld [vmem:[#allocation19 + $0x58] sm:$0xff] }
0x1a55   : > { %v5723_v60 = vpop.eup %5722  ;;  %5307 = vmatprep.mubr.msk.f32.mxu0 %vm6148_vm0, %v6149_v2 }
0x1a56   : > { %5275 = vmatmul.mubr.msk.f32.vlgmr.msra.gmra.mrb[32].mxu1 %vm1775_vm6, %v3624_v59  ;;  %v3626_v61 = vmul.f32 %v5723_v60, %v5715_v45  ;;  %v5493_v59 = vpack.c.bf16 %v4294_v58, %v4293_v57  ;;  %v4295_v60 = vld [vmem:[#allocation19 + $0x60] sm:$0xff] }
0x1a57   : > { %5283 = vmatpush3.msk.msra.mxu1 %vm1799_vm5, %v3301_v52  ;;  %5284 = vmatprep.mubr.msk.f32.mxu1 %vm6148_vm0, %v6149_v2  ;;  %v4291_v52 = vld [vmem:[#allocation19 + $0x40] sm:$0xff] }
0x1a58   : > { %5471 = vmatprep.subr.bf16.mxu1 %v6147_v1  ;;  %v5490_v56 = vpack.c.bf16 %v4292_v53, %v4291_v52 }
0x1a5a   : > { %5285 = vmatmul.mubr.msk.f32.vlgmr.msra.gmra.mrb[34].mxu1 %vm1775_vm6, %v3626_v61  ;;  %v4296_v61 = vld [vmem:[#allocation19 + $0x68] sm:$0xff] }
0x1a5b   : > { %5300 = vmatprep.mubr.msk.f32.mxu1 %vm6148_vm0, %v6149_v2  ;;  %5473 = vmatpush3.bf16.msra.mxu1 %v5472_v3  ;;  %v5496_v62 = vpack.c.bf16 %v4296_v61, %v4295_v60  ;;  %v5499_v3 = vpack.c.bf16 %v4298_v0, %v4297_v63 }
0x1a5c   : > { %5474 = vmatprep.subr.bf16.mxu1 %v6147_v1 }
0x1a5f   : > { %5476 = vmatpush3.bf16.msra.mxu1 %v5475_v5 }
0x1a60   : > { %5486 = vmatprep.subr.bf16.mxu1 %v6147_v1 }
0x1b23   : > { %v3774_v6 = vpop.f32.mrb[38].mxu0 }
0x1b24   : > { %3929 = vrot.lane.b32.xlu0 %v3774_v6, %s7063_s29  ;;  %v5281_v7 = vpop.f32.mrb[39].mxu0 }
0x1b27   : > { %v3924_v8 = vpop.f32.mrb[40].mxu0 }
0x1b28   : > { %3937 = vrot.lane.b32.xlu0 %v3924_v8, %s7064_s22  ;;  %v5291_v9 = vpop.f32.mrb[41].mxu0  ;;  %s4798_s22 = sshll.u32 %s7074_s12, 3 }
0x1b29   : > { %v3699_v10 = vpop.f32.mrb[32].mxu1  ;;  %s723_s3 = scalar_lea.vmem %s7068_s26, %s4798_s22 }
0x1b2a   : > { %v5276_v11 = vpop.f32.mrb[33].mxu1 }
0x1b2b   : > { %v4869_v11 = vld [vmem:[%s7062_s30 + $0x8] sm:$0xff] }
0x1b2d   : > { %v3849_v12 = vpop.f32.mrb[34].mxu1 }
0x1b2e   : > { %3933 = vrot.lane.b32.xlu1 %v3849_v12, %s7065_s0  ;;  %v5286_v13 = vpop.f32.mrb[35].mxu1  ;;  %s7066_s0 = sld [smem:[#allocation37_spill]] }
0x1b34   : > { %v4515_v38 = vld [vmem:[%s7066_s0 + $0x10] sm:$0xff] }
0x1b96   : > { %v3930_v14 = vpop.permute.xlu0 %3929 }
0x1b97   : > { %v3940_v15 = vsel %vm735_vm1, %v3699_v10, %v3930_v14 }
0x1b9a   : > { %v3938_v17 = vpop.permute.xlu0 %3937 }
0x1ba0   : > { %v3934_v16 = vpop.permute.xlu1 %3933 }
0x1ba1   : > { %v3941_v18 = vsel %vm737_vm2, %v3940_v15, %v3934_v16 }
0x1ba2   : > { %v3942_v19 = vsel %vm743_vm3, %v3941_v18, %v3938_v17 }
0x1ba3   : > { %5301 = vmatmul.mubr.msk.f32.vlgmr.msra.gmra.mrb[36].mxu1 %vm825_vm4, %v3942_v19 }
0x1ba4   : > { %5325 = vmatprep.mubr.msk.f32.mxu1 %vm6148_vm0, %v6149_v2 }
0x1c76   : > { %v4017_v20 = vpop.f32.mrb[36].mxu1 }
0x1c77   : > { %4024 = vrot.lane.b32.xlu1 %v4017_v20, %s6152_s14  ;;  %v5302_v21 = vpop.f32.mrb[37].mxu1 }
0x1ce9   : > { %v4025_v22 = vpop.permute.xlu1 %4024 }
0x1cea   : > { %v5478_v23 = vpack.c.bf16 %v4025_v22, %v4017_v20 }
0x1cec   : > { %5479 = vmatpush3.bf16.msra.mxu0 %v5478_v23 }
0x1ced   : > { %5480 = vmatprep.subr.bf16.mxu0 %v6147_v1 }
0x1cef   : > { %5308 = vmatmul.mubr.msk.f32.vlgmr.msra.gmra.mrb[42].mxu0 %vm737_vm2, %v4022_v24 }
0x1cf0   : > { %5318 = vmatprep.mubr.msk.f32.mxu0 %vm6148_vm0, %v6149_v2 }
0x1dc2   : > { %v4096_v25 = vpop.f32.mrb[42].mxu0 }
0x1dc3   : > { %v4100_v26 = vadd.f32 %v4096_v25, %v6796_v35  ;;  %v5309_v27 = vpop.f32.mrb[43].mxu0  ;;  %v5481_v35 = vpack.c.bf16 %v4863_v36, %v4862_v34  ;;  %v4871_v25 = vld [vmem:[#allocation20 + $0x6] ss:$0 sm:$0xff]  ;;  %v4513_v36 = vld [vmem:[%s7066_s0] sm:$0xff] }
0x1dc5   : > { %v4105_v29 = vsel %vm825_vm4, %v4100_v26, 0.0  ;;  %5482 = vmatpush3.bf16.msra.mxu0 %v5481_v35  ;;  %v4514_v35 = vld [vmem:[%s7066_s0 + $0x8] sm:$0xff] }
0x1dc6   : > { %4106 = vadd.xlane.f32.xlu0 %v4105_v29  ;;  %5483 = vmatprep.subr.bf16.mxu0 %v6147_v1  ;;  %v5505_v37 = vpack.c.bf16 %v4514_v35, %v4513_v36 }
0x1dc9   : > { %5485 = vmatpush3.bf16.msra.mxu0 %v5484_v39  ;;  %v4516_v39 = vld [vmem:[%s7066_s0 + $0x18] sm:$0xff] }
0x1dca   : > { %5501 = vmatprep.subr.bf16.mxu0 %v6147_v1 }
0x1e53   : > { %v4107_v30 = vpop.xlane.xlu0 %4106 }
0x1e54   : > { %v4108_v28 = vmul.f32 0.03125, %v4107_v30 }
0x1e56   : > { %v4109_v31 = vsub.f32 %v4100_v26, %v4108_v28  ;;  %v4872_v26 = vld [vmem:[#allocation20 + $0x7] ss:$0 sm:$0xff] }
0x1e58   : > { %v4110_v32 = vmul.f32 %v4109_v31, %v4109_v31 }
0x1e5a   : > { %v4111_v33 = vsel %vm825_vm4, %v4110_v32, 0.0 }
0x1e5b   : > { %4112 = vadd.xlane.f32.xlu1 %v4111_v33 }
0x1ee8   : > { %v4113_v40 = vpop.xlane.xlu1 %4112 }
0x1ee9   : > { %v4114_v41 = vmul.f32 0.03125, %v4113_v40  ;;  %v5508_v40 = vpack.c.bf16 %v4516_v39, %v4515_v38 }
0x1eeb   : > { %v4115_v42 = vadd.f32 1e-05, %v4114_v41 }
0x1eed   : > { %5724 = vrsqrt.f32 %v4115_v42 }
0x1ef7   : > { %v5725_v43 = vpop.eup %5724 }
0x1ef8   : > { %v4117_v45 = vmul.f32 %v5725_v43, %v4109_v31 }
0x1efa   : > { %v4124_v47 = vmul.f32 %v4860_v44, %v4117_v45 }
0x1efc   : > { %v4131_v48 = vadd.f32 %v4861_v46, %v4124_v47 }
0x1efe   : > { %5319 = vmatmul.mubr.msk.f32.vlgmr.msra.gmra.mrb[44].mxu0 %vm825_vm4, %v4131_v48 }
0x1eff   : > { %5351 = vmatprep.mubr.msk.f32.mxu0 %vm6148_vm0, %v6149_v2 }
0x1fd1   : > { %v4206_v49 = vpop.f32.mrb[44].mxu0 }
0x1fd2   : > { %4213 = vrot.lane.b32.xlu0 %v4206_v49, %s6153_s15  ;;  %v5320_v50 = vpop.f32.mrb[45].mxu0  ;;  %s7067_s15 = sld [smem:[#allocation36_spill]] }
0x1fd8   : > { %v4875_v46 = vld [vmem:[%s7067_s15 + $0x1] ss:$0 sm:$0xff] }
0x2044   : > { %v4214_v51 = vpop.permute.xlu0 %4213 }
0x2045   : > { %v5487_v54 = vpack.c.bf16 %v4214_v51, %v4206_v49  ;;  %v4876_v49 = vld [vmem:[#allocation2] ss:$0 sm:$0xff] }
0x2047   : > { %5488 = vmatpush3.bf16.msra.mxu1 %v5487_v54 }
0x2048   : > { %5489 = vmatprep.subr.bf16.mxu1 %v6147_v1 }
0x204a   : > { %5326 = vmatmul.mubr.msk.f32.vlgmr.msra.gmra.mrb[38].mxu1 %vm737_vm2, %v4211_v55 }
0x204b   : > { %5491 = vmatpush3.bf16.msra.mxu1 %v5490_v56  ;;  %5344 = vmatprep.mubr.msk.f32.mxu1 %vm6148_vm0, %v6149_v2 }
0x204c   : > { %5492 = vmatprep.subr.bf16.mxu1 %v6147_v1 }
0x204f   : > { %5494 = vmatpush3.bf16.msra.mxu1 %v5493_v59 }
0x2050   : > { %5495 = vmatprep.subr.bf16.mxu1 %v6147_v1 }
0x2053   : > { %5497 = vmatpush3.bf16.msra.mxu1 %v5496_v62 }
0x2054   : > { %5498 = vmatprep.subr.bf16.mxu1 %v6147_v1 }
0x2057   : > { %5500 = vmatpush3.bf16.msra.mxu1 %v5499_v3 }
0x211d   : > { %v4285_v4 = vpop.f32.mrb[38].mxu1 }
0x211e   : > { %v4289_v5 = vmax.f32 %v4285_v4, 0.0  ;;  %v5327_v6 = vpop.f32.mrb[39].mxu1 }
0x2120   : > { %5345 = vmatmul.mubr.msk.f32.vlgmr.msra.gmra.mrb[40].mxu1 %vm2463_vm7, %v4289_v5 }
0x21f3   : > { %v4368_v7 = vpop.f32.mrb[40].mxu1 }
0x21f4   : > { %4375 = vrot.lane.b32.xlu1 %v4368_v7, %s6152_s14  ;;  %v5346_v8 = vpop.f32.mrb[41].mxu1 }
0x2266   : > { %v4376_v9 = vpop.permute.xlu1 %4375 }
0x2267   : > { %v5502_v10 = vpack.c.bf16 %v4376_v9, %v4368_v7 }
0x2269   : > { %5503 = vmatpush3.bf16.msra.mxu0 %v5502_v10 }
0x226a   : > { %5504 = vmatprep.subr.bf16.mxu0 %v6147_v1 }
0x226c   : > { %5352 = vmatmul.mubr.msk.f32.vlgmr.msra.gmra.mrb[46].mxu0 %vm737_vm2, %v4869_v11 }
0x226d   : > { %5362 = vmatprep.mubr.msk.f32.mxu0 %vm6148_vm0, %v6149_v2  ;;  %5506 = vmatpush3.bf16.msra.mxu0 %v5505_v37 }
0x226e   : > { %5507 = vmatprep.subr.bf16.mxu0 %v6147_v1  ;;  %v4874_v1 = vld [vmem:[%s7067_s15] ss:$0 sm:$0xff] }
0x2271   : > { %5509 = vmatpush3.bf16.msra.mxu0 %v5508_v40 }
0x233f   : > { %v4447_v12 = vpop.f32.mrb[46].mxu0 }
0x2340   : > { %v4451_v13 = vadd.f32 %v4447_v12, %v4131_v48  ;;  %v5353_v14 = vpop.f32.mrb[47].mxu0 }
0x2342   : > { %v4456_v15 = vsel %vm825_vm4, %v4451_v13, 0.0 }
0x2343   : > { %4457 = vadd.xlane.f32.xlu0 %v4456_v15 }
0x23d0   : > { %v4458_v16 = vpop.xlane.xlu0 %4457 }
0x23d1   : > { %v4459_v17 = vmul.f32 0.03125, %v4458_v16 }
0x23d3   : > { %v4460_v18 = vsub.f32 %v4451_v13, %v4459_v17 }
0x23d5   : > { %v4461_v19 = vmul.f32 %v4460_v18, %v4460_v18 }
0x23d7   : > { %v4462_v20 = vsel %vm825_vm4, %v4461_v19, 0.0 }
0x23d8   : > { %4463 = vadd.xlane.f32.xlu1 %v4462_v20 }
0x2465   : > { %v4464_v21 = vpop.xlane.xlu1 %4463 }
0x2466   : > { %v4465_v22 = vmul.f32 0.03125, %v4464_v21 }
0x2468   : > { %v4466_v23 = vadd.f32 1e-05, %v4465_v22 }
0x246a   : > { %5726 = vrsqrt.f32 %v4466_v23 }
0x2474   : > { %v5727_v24 = vpop.eup %5726 }
0x2475   : > { %v4468_v2 = vmul.f32 %v5727_v24, %v4460_v18 }
0x2477   : > { %v4475_v27 = vmul.f32 %v4871_v25, %v4468_v2 }
0x2479   : > { %v4482_v29 = vadd.f32 %v4872_v26, %v4475_v27 }
0x247b   : > { %v4486_v30 = vsel %vm825_vm4, %v4482_v29, 0.0 }
0x247c   : > { %4487 = vadd.xlane.f32.xlu0 %v4486_v30 }
0x2509   : > { %v4488_v28 = vpop.xlane.xlu0 %4487 }
0x250a   : > { %v4489_v31 = vmul.f32 0.03125, %v4488_v28 }
0x250c   : > { %v4490_v32 = vsub.f32 %v4482_v29, %v4489_v31 }
0x250e   : > { %v4491_v33 = vmul.f32 %v4490_v32, %v4490_v32 }
0x2510   : > { %v4492_v34 = vsel %vm825_vm4, %v4491_v33, 0.0 }
0x2511   : > { %4493 = vadd.xlane.f32.xlu0 %v4492_v34 }
0x259e   : > { %v4494_v41 = vpop.xlane.xlu0 %4493 }
0x259f   : > { %v4495_v42 = vmul.f32 0.03125, %v4494_v41 }
0x25a1   : > { %v4496_v43 = vadd.f32 1e-05, %v4495_v42 }
0x25a3   : > { %5728 = vrsqrt.f32 %v4496_v43 }
0x25ad   : > { %v5729_v44 = vpop.eup %5728 }
0x25ae   : > { %v4498_v45 = vmul.f32 %v5729_v44, %v4490_v32 }
0x25b0   : > { %v4505_v47 = vmul.f32 %v4874_v1, %v4498_v45 }
0x25b2   : > { %v4512_v48 = vadd.f32 %v4875_v46, %v4505_v47 }
0x25b4   : > { %5363 = vmatmul.mubr.msk.f32.vlgmr.msra.gmra.mrb[48].mxu0 %vm825_vm4, %v4512_v48 }
0x2687   : > { %v4593_v50 = vpop.f32.mrb[48].mxu0 }
0x2688   : > { %v4594_v51 = vadd.f32 %v4876_v49, %v4593_v50  ;;  %v5364_v52 = vpop.f32.mrb[49].mxu0 }
0x268a   : > { %4598 = vst.msk [vmem:[%s723_s3] sm:$0xff] %vm4597_vm8, %v4594_v51 }
0x268b PF: > { %p35_p9 = scmp.ge.s32.totalorder %s6542_s20, 4   ;;  %s7069_s26 = smov %s6118_s27 }
0x268c   : > { %s7070_s27 = smov %s6122_s28  ;;  %s7071_s28 = smov %s6554_s9 }
0x268d   : > { %s7072_s29 = smov %s6542_s20  ;;  %37 = sbr.rel (!%p35_p9) target bundleno = 18 (0x12), region = 198 }
0x2694   :  { %4618 = vsyncpa [#allocation4], 1 }
0x2695   :  { %4620 = vsyncpa [#allocation4 + $0x1], 1 }
0x2696   :  { %4621 = vsyncpa [#allocation6], 1 }
0x2697   :  { %4622 = vsyncpa [#allocation9], 1 }
0x2698   :  { %4623 = vsyncpa [#allocation12], 1 }
0x2699   :  { %4624 = vsyncpa [#allocation15], 1 }
0x269a   :  { %4625 = vsyncpa [#allocation18], 1 }
0x269b   :  { %4626 = vsyncpa [#allocation21], 1 }

</bundles_post_ra>
